<compile_context>
chip_gen: v6e
topology: v6e:2x2x1
jax: 0.10.0
libtpu: 0.0.40
codegen_flags: <defaults>
</compile_context>

<pallas_src>
import math

import jax
import jax.numpy as jnp
from jax.experimental import pallas as pl
from jax.experimental.pallas import tpu as pltpu

# ---------------- configuration (tiny CLIP-style vision tower) -----------------------
BATCH = 2
CHANNELS = 3
IMAGE = 16
PATCH = 8
NUM_PATCHES = (IMAGE // PATCH) * (IMAGE // PATCH)   # 4
SEQ = NUM_PATCHES + 1                               # 5  (CLS + patches)
HIDDEN = 32
HEADS = 2
HEAD_DIM = HIDDEN // HEADS                          # 16
INTERMEDIATE = 64
LAYERS = 2
PROJ_DIM = 32                                       # model.output_dim / proj width
EPS = 1e-5
TOKENS = BATCH * SEQ                                # 10
PATCH_FEATS = CHANNELS * PATCH * PATCH              # 192

# packed-slab layout constants
OUT_LANES = 128                                     # lane-dense output slab width
WA_LANES = 384                                      # [wqkv | pad | wo | pad | w1 | pad]
WQKV_OFF = 0                                        # lanes   0: 96
WO_OFF = 128                                        # lanes 128:160
W1_OFF = 256                                        # lanes 256:320
PS_LANES = 128                                      # per-layer LN/bias slab width
# pslab rows: 0 ln1_w, 1 ln1_b, 2 ln2_w, 3 ln2_b, 4 bqkv, 5 bo, 6 b1, 7 b2
_N_INPUTS = 7


# ---------------- in-kernel helpers ---------------------------------------------------
def _layernorm(x, w, b):
    # x: [..., D], w/b: [1, D]
    mu = jnp.mean(x, axis=-1, keepdims=True)
    var = jnp.mean((x - mu) * (x - mu), axis=-1, keepdims=True)
    return (x - mu) * jax.lax.rsqrt(var + EPS) * w + b


# ---------------- the single fused kernel ---------------------------------------------
def fused_vision_kernel(
    patches_ref,   # [TOKENS, C*ph*pw]  (zero row at every CLS position)
    patch_w_ref,   # [C*ph*pw, D]
    small_ref,     # [TOKENS+4, D]      rows 0..TOKENS-1: tok_add (pos + cls on CLS rows)
                   #                    rows TOKENS..: pre_w, pre_b, post_w, post_b
    proj_ref,      # [D, OUT_LANES]     visual projection, zero-padded to 128 lanes
    wa_ref,        # [L, D, WA_LANES]   wqkv (Q pre-scaled) | wo | w1, 128-lane aligned
    w2_ref,        # [L, I, D]
    ps_ref,        # [L, 8, PS_LANES]   ln1_w, ln1_b, ln2_w, ln2_b, bqkv, bo, b1, b2
    out_ref,       # [TOKENS, OUT_LANES]
):
    f32 = jnp.float32

    # batch-block-diagonal attention mask (tokens attend only within their own image);
    # built once from 2-D iotas with compares (no vector integer division needed).
    r = jax.lax.broadcasted_iota(jnp.int32, (TOKENS, TOKENS), 0)
    c = jax.lax.broadcasted_iota(jnp.int32, (TOKENS, TOKENS), 1)
    bmask = jnp.zeros((TOKENS, TOKENS), dtype=jnp.bool_)
    for b in range(BATCH):
        lo, hi = b * SEQ, (b + 1) * SEQ
        bmask = jnp.logical_or(bmask, (r >= lo) & (r < hi) & (c >= lo) & (c < hi))
    neg = jnp.float32(-1e30)

    # ---- patch embedding + CLS/pos add: single matmul, residual stream stays in regs ---
    x = (
        jnp.dot(patches_ref[...], patch_w_ref[...], preferred_element_type=f32)
        + small_ref[0:TOKENS, :]
    )

    # ---- pre-LayerNorm ------------------------------------------------------------------
    x = _layernorm(x, small_ref[TOKENS : TOKENS + 1, :], small_ref[TOKENS + 1 : TOKENS + 2, :])

    # ---- transformer encoder layers (static unroll; LAYERS=2, weights VMEM-resident) ---
    # TODO(synk): at real dims move this loop to an "arbitrary" grid axis (layer-streamed
    # weights, x as resident accumulator) and use lax.fori_loop(unroll=True) for heads.
    for l in range(LAYERS):
        wa = wa_ref[l]                                  # [D, WA_LANES]
        w2 = w2_ref[l]                                  # [I, D]
        ps = ps_ref[l]                                  # [8, PS_LANES]

        h = _layernorm(x, ps[0:1, 0:HIDDEN], ps[1:2, 0:HIDDEN])

        # fused QKV projection: one [TOKENS, D] @ [D, 3D] matmul (scale folded into Q)
        qkv = (
            jnp.dot(h, wa[:, WQKV_OFF : WQKV_OFF + 3 * HIDDEN], preferred_element_type=f32)
            + ps[4:5, 0 : 3 * HIDDEN]
        )

        # masked full-token attention per head: 2 matmuls/head over all batches at once,
        # Wo folded per head so concat-heads never materializes.
        attn = ps[5:6, 0:HIDDEN]                        # start from bo, broadcasts
        for hh in range(HEADS):
            c0 = hh * HEAD_DIM
            q = qkv[:, c0 : c0 + HEAD_DIM]
            k = qkv[:, HIDDEN + c0 : HIDDEN + c0 + HEAD_DIM]
            v = qkv[:, 2 * HIDDEN + c0 : 2 * HIDDEN + c0 + HEAD_DIM]
            s = jnp.einsum("qe,ke->qk", q, k, preferred_element_type=f32)   # [T, T]
            s = jnp.where(bmask, s, neg)
            s = s - jnp.max(s, axis=-1, keepdims=True)
            p = jnp.exp(s)
            p = p * pl.reciprocal(jnp.sum(p, axis=-1, keepdims=True), approx=True)
            o_h = jnp.dot(p, v, preferred_element_type=f32)                 # [T, hd]
            wo_h = wa[c0 : c0 + HEAD_DIM, WO_OFF : WO_OFF + HIDDEN]         # [hd, D]
            attn = attn + jnp.dot(o_h, wo_h, preferred_element_type=f32)
        x = x + attn                                    # residual 1

        # MLP with quick_gelu
        h2 = _layernorm(x, ps[2:3, 0:HIDDEN], ps[3:4, 0:HIDDEN])
        f = (
            jnp.dot(h2, wa[:, W1_OFF : W1_OFF + INTERMEDIATE], preferred_element_type=f32)
            + ps[6:7, 0:INTERMEDIATE]
        )
        f = f * jax.nn.sigmoid(1.702 * f)
        f = jnp.dot(f, w2, preferred_element_type=f32) + ps[7:8, 0:HIDDEN]
        x = x + f                                       # residual 2

    # ---- post-LayerNorm + visual projection (128-lane padded -> one unmasked store) ----
    x = _layernorm(x, small_ref[TOKENS + 2 : TOKENS + 3, :], small_ref[TOKENS + 3 : TOKENS + 4, :])
    out_ref[...] = jnp.dot(x, proj_ref[...], preferred_element_type=f32)


# ---------------- JAX glue --------------------------------------------------------------
def extract_patches_tok(x):
    """[B, C, H, W] (NCHW) -> [TOKENS, C*ph*pw] im2col with a zero row per CLS position."""
    B, C, H, W = x.shape
    p = PATCH
    xp = x.reshape(B, C, H // p, p, W // p, p)
    xp = xp.transpose(0, 2, 4, 1, 3, 5)                 # [B, H/p, W/p, C, p, p]
    xp = xp.reshape(B, NUM_PATCHES, C * p * p)
    cls_rows = jnp.zeros((B, 1, C * p * p), x.dtype)     # CLS rows contribute 0 to the matmul
    return jnp.concatenate([cls_rows, xp], axis=1).reshape(B * SEQ, C * p * p)


def init_params(key):
    keys = iter(jax.random.split(key, 64))

    def nrm(shape, scale=0.02):
        return (scale * jax.random.normal(next(keys), shape)).astype(jnp.float32)

    attn_scale = 1.0 / math.sqrt(HEAD_DIM)              # folded into Q weight/bias

    # ---- global small params packed into one slab ------------------------------------
    cls = nrm((1, HIDDEN))
    pos = nrm((SEQ, HIDDEN))
    per_image = pos + jnp.pad(cls, ((0, SEQ - 1), (0, 0)))        # cls added on row 0
    tok_add = jnp.tile(per_image, (BATCH, 1))                      # [TOKENS, D]
    small = jnp.concatenate(
        [tok_add,
         jnp.ones((1, HIDDEN), jnp.float32),   # pre-LN w
         jnp.zeros((1, HIDDEN), jnp.float32),  # pre-LN b
         jnp.ones((1, HIDDEN), jnp.float32),   # post-LN w
         jnp.zeros((1, HIDDEN), jnp.float32)], # post-LN b
        axis=0,
    )                                                              # [TOKENS+4, D]

    proj = nrm((HIDDEN, PROJ_DIM))
    proj_pad = jnp.zeros((HIDDEN, OUT_LANES), jnp.float32).at[:, :PROJ_DIM].set(proj)

    # ---- per-layer weights packed into 128-lane-aligned slabs -------------------------
    wa_layers, ps_layers, w2_layers = [], [], []
    for _ in range(LAYERS):
        wq = nrm((HIDDEN, HIDDEN)) * attn_scale
        bq = nrm((1, HIDDEN)) * attn_scale
        wk = nrm((HIDDEN, HIDDEN)); bk = nrm((1, HIDDEN))
        wv = nrm((HIDDEN, HIDDEN)); bv = nrm((1, HIDDEN))
        wqkv = jnp.concatenate([wq, wk, wv], axis=1)               # [D, 3D]
        bqkv = jnp.concatenate([bq, bk, bv], axis=1)               # [1, 3D]
        wo = nrm((HIDDEN, HIDDEN)); bo = nrm((1, HIDDEN))
        w1 = nrm((HIDDEN, INTERMEDIATE)); b1 = nrm((1, INTERMEDIATE))
        w2 = nrm((INTERMEDIATE, HIDDEN)); b2 = nrm((1, HIDDEN))

        wa = jnp.zeros((HIDDEN, WA_LANES), jnp.float32)
        wa = wa.at[:, WQKV_OFF : WQKV_OFF + 3 * HIDDEN].set(wqkv)
        wa = wa.at[:, WO_OFF : WO_OFF + HIDDEN].set(wo)
        wa = wa.at[:, W1_OFF : W1_OFF + INTERMEDIATE].set(w1)
        wa_layers.append(wa)

        ps = jnp.zeros((8, PS_LANES), jnp.float32)
        ps = ps.at[0, 0:HIDDEN].set(1.0)                           # ln1_w
        ps = ps.at[2, 0:HIDDEN].set(1.0)                           # ln2_w
        ps = ps.at[4, 0 : 3 * HIDDEN].set(bqkv[0])
        ps = ps.at[5, 0:HIDDEN].set(bo[0])
        ps = ps.at[6, 0:INTERMEDIATE].set(b1[0])
        ps = ps.at[7, 0:HIDDEN].set(b2[0])
        ps_layers.append(ps)

        w2_layers.append(w2)

    return {
        # NOTE: patch conv weight is flattened as [C*ph*pw, D]; when porting real
        # HF/OpenCLIP weights ([D, C, ph, pw]) the transpose must match extract_patches_tok.
        "patch_w": nrm((PATCH_FEATS, HIDDEN)),
        "small": small,
        "proj_pad": proj_pad,
        "wa": jnp.stack(wa_layers),
        "w2": jnp.stack(w2_layers),
        "pslab": jnp.stack(ps_layers),
    }


@jax.jit
def open_clip_vision_encoder_forward(x, params):
    patches = extract_patches_tok(x)                    # layout-prep glue (im2col + CLS rows)
    out2d = pl.pallas_call(
        fused_vision_kernel,
        out_shape=jax.ShapeDtypeStruct((TOKENS, OUT_LANES), jnp.float32),
        in_specs=[pl.BlockSpec(memory_space=pltpu.MemorySpace.VMEM)] * _N_INPUTS,
        out_specs=pl.BlockSpec(memory_space=pltpu.MemorySpace.VMEM),
    )(
        patches, params["patch_w"], params["small"], params["proj_pad"],
        params["wa"], params["w2"], params["pslab"],
    )
    # lane-dense (128-wide) kernel output; slice off the padding and reshape to tokens.
    # torch .squeeze(dim=1) is a no-op here (SEQ > 1, identity pooling keeps tokens);
    # pooled/cls embedding is out[:, 0].
    return out2d[:, :PROJ_DIM].reshape(BATCH, SEQ, PROJ_DIM)


if __name__ == "__main__":
    key = jax.random.PRNGKey(0)
    k_img, k_par = jax.random.split(key)
    x = jax.random.normal(k_img, (BATCH, CHANNELS, IMAGE, IMAGE), dtype=jnp.float32)
    params = init_params(k_par)

    out = open_clip_vision_encoder_forward(x, params)
    out = jax.block_until_ready(out)

    assert out.shape == (BATCH, SEQ, PROJ_DIM), out.shape
    assert jnp.all(jnp.isfinite(out))
    print("KERNEL_OK")
</pallas_src>

<mosaic_0001>
module attributes {stable_mosaic.version = 11 : i64} {
  func.func @fused_vision_kernel(%arg0: memref<10x192xf32, #tpu.memory_space<vmem>>, %arg1: memref<192x32xf32, #tpu.memory_space<vmem>>, %arg2: memref<14x32xf32, #tpu.memory_space<vmem>>, %arg3: memref<32x128xf32, #tpu.memory_space<vmem>>, %arg4: memref<2x32x384xf32, #tpu.memory_space<vmem>>, %arg5: memref<2x64x32xf32, #tpu.memory_space<vmem>>, %arg6: memref<2x8x128xf32, #tpu.memory_space<vmem>>, %arg7: memref<10x128xf32, #tpu.memory_space<vmem>>) attributes {dimension_semantics = [], scalar_prefetch = 0 : i64, scratch_operands = 0 : i64, tpu.core_type = #tpu.core_type<tc>} {
    %0 = tpu.iota {dimensions = array<i32: 0>} : vector<10x10xi32>
    %1 = tpu.iota {dimensions = array<i32: 1>} : vector<10x10xi32>
    %false = arith.constant false
    %2 = vector.broadcast %false : i1 to vector<10x10xi1>
    %c0_i32 = arith.constant 0 : i32
    %3 = vector.broadcast %c0_i32 : i32 to vector<10x10xi32>
    %4 = arith.cmpi sge, %0, %3 : vector<10x10xi32>
    %c5_i32 = arith.constant 5 : i32
    %5 = vector.broadcast %c5_i32 : i32 to vector<10x10xi32>
    %6 = arith.cmpi slt, %0, %5 : vector<10x10xi32>
    %7 = arith.andi %4, %6 : vector<10x10xi1>
    %c0_i32_0 = arith.constant 0 : i32
    %8 = vector.broadcast %c0_i32_0 : i32 to vector<10x10xi32>
    %9 = arith.cmpi sge, %1, %8 : vector<10x10xi32>
    %10 = arith.andi %7, %9 : vector<10x10xi1>
    %c5_i32_1 = arith.constant 5 : i32
    %11 = vector.broadcast %c5_i32_1 : i32 to vector<10x10xi32>
    %12 = arith.cmpi slt, %1, %11 : vector<10x10xi32>
    %13 = arith.andi %10, %12 : vector<10x10xi1>
    %14 = arith.ori %2, %13 : vector<10x10xi1>
    %c5_i32_2 = arith.constant 5 : i32
    %15 = vector.broadcast %c5_i32_2 : i32 to vector<10x10xi32>
    %16 = arith.cmpi sge, %0, %15 : vector<10x10xi32>
    %c10_i32 = arith.constant 10 : i32
    %17 = vector.broadcast %c10_i32 : i32 to vector<10x10xi32>
    %18 = arith.cmpi slt, %0, %17 : vector<10x10xi32>
    %19 = arith.andi %16, %18 : vector<10x10xi1>
    %c5_i32_3 = arith.constant 5 : i32
    %20 = vector.broadcast %c5_i32_3 : i32 to vector<10x10xi32>
    %21 = arith.cmpi sge, %1, %20 : vector<10x10xi32>
    %22 = arith.andi %19, %21 : vector<10x10xi1>
    %c10_i32_4 = arith.constant 10 : i32
    %23 = vector.broadcast %c10_i32_4 : i32 to vector<10x10xi32>
    %24 = arith.cmpi slt, %1, %23 : vector<10x10xi32>
    %25 = arith.andi %22, %24 : vector<10x10xi1>
    %26 = arith.ori %14, %25 : vector<10x10xi1>
    %c0 = arith.constant 0 : index
    %c0_5 = arith.constant 0 : index
    %27 = vector.load %arg0[%c0, %c0_5] : memref<10x192xf32, #tpu.memory_space<vmem>>, vector<10x192xf32>
    %c0_6 = arith.constant 0 : index
    %c0_7 = arith.constant 0 : index
    %28 = vector.load %arg1[%c0_6, %c0_7] : memref<192x32xf32, #tpu.memory_space<vmem>>, vector<192x32xf32>
    %cst = arith.constant dense<0.000000e+00> : vector<10x32xf32>
    %29 = tpu.matmul %27, %28, %cst {dimension_numbers = #tpu.dot_dimension_numbers<[1], [0], [0], [1], [0, 0, 1, 1], [], []>} : vector<10x192xf32>, vector<192x32xf32>, vector<10x32xf32> -> vector<10x32xf32>
    %c0_8 = arith.constant 0 : index
    %c0_9 = arith.constant 0 : index
    %30 = vector.load %arg2[%c0_8, %c0_9] : memref<14x32xf32, #tpu.memory_space<vmem>>, vector<10x32xf32>
    %31 = arith.addf %29, %30 : vector<10x32xf32>
    %c10 = arith.constant 10 : index
    %c0_10 = arith.constant 0 : index
    %32 = vector.load %arg2[%c10, %c0_10] : memref<14x32xf32, #tpu.memory_space<vmem>>, vector<1x32xf32>
    %c11 = arith.constant 11 : index
    %c0_11 = arith.constant 0 : index
    %33 = vector.load %arg2[%c11, %c0_11] : memref<14x32xf32, #tpu.memory_space<vmem>>, vector<1x32xf32>
    %cst_12 = arith.constant dense<0.000000e+00> : vector<10xf32>
    %34 = vector.multi_reduction <add>, %31, %cst_12 [1] : vector<10x32xf32> to vector<10xf32>
    %35 = vector.shape_cast %34 : vector<10xf32> to vector<10x1xf32>
    %cst_13 = arith.constant 3.200000e+01 : f32
    %36 = vector.broadcast %cst_13 : f32 to vector<10x1xf32>
    %37 = arith.divf %35, %36 : vector<10x1xf32>
    %38 = vector.broadcast %37 : vector<10x1xf32> to vector<10x32xf32>
    %39 = arith.subf %31, %38 : vector<10x32xf32>
    %40 = vector.broadcast %37 : vector<10x1xf32> to vector<10x32xf32>
    %41 = arith.subf %31, %40 : vector<10x32xf32>
    %42 = arith.mulf %39, %41 : vector<10x32xf32>
    %cst_14 = arith.constant dense<0.000000e+00> : vector<10xf32>
    %43 = vector.multi_reduction <add>, %42, %cst_14 [1] : vector<10x32xf32> to vector<10xf32>
    %44 = vector.shape_cast %43 : vector<10xf32> to vector<10x1xf32>
    %cst_15 = arith.constant 3.200000e+01 : f32
    %45 = vector.broadcast %cst_15 : f32 to vector<10x1xf32>
    %46 = arith.divf %44, %45 : vector<10x1xf32>
    %47 = vector.broadcast %37 : vector<10x1xf32> to vector<10x32xf32>
    %48 = arith.subf %31, %47 : vector<10x32xf32>
    %cst_16 = arith.constant 9.99999974E-6 : f32
    %49 = vector.broadcast %cst_16 : f32 to vector<10x1xf32>
    %50 = arith.addf %46, %49 : vector<10x1xf32>
    %51 = math.rsqrt %50 : vector<10x1xf32>
    %52 = vector.broadcast %51 : vector<10x1xf32> to vector<10x32xf32>
    %53 = arith.mulf %48, %52 : vector<10x32xf32>
    %54 = vector.broadcast %32 : vector<1x32xf32> to vector<10x32xf32>
    %55 = arith.mulf %53, %54 : vector<10x32xf32>
    %56 = vector.broadcast %33 : vector<1x32xf32> to vector<10x32xf32>
    %57 = arith.addf %55, %56 : vector<10x32xf32>
    %c0_17 = arith.constant 0 : index
    %c0_18 = arith.constant 0 : index
    %c0_19 = arith.constant 0 : index
    %58 = vector.load %arg4[%c0_17, %c0_18, %c0_19] : memref<2x32x384xf32, #tpu.memory_space<vmem>>, vector<1x32x384xf32>
    %59 = vector.shape_cast %58 : vector<1x32x384xf32> to vector<32x384xf32>
    %c0_20 = arith.constant 0 : index
    %c0_21 = arith.constant 0 : index
    %c0_22 = arith.constant 0 : index
    %60 = vector.load %arg5[%c0_20, %c0_21, %c0_22] : memref<2x64x32xf32, #tpu.memory_space<vmem>>, vector<1x64x32xf32>
    %61 = vector.shape_cast %60 : vector<1x64x32xf32> to vector<64x32xf32>
    %c0_23 = arith.constant 0 : index
    %c0_24 = arith.constant 0 : index
    %c0_25 = arith.constant 0 : index
    %62 = vector.load %arg6[%c0_23, %c0_24, %c0_25] : memref<2x8x128xf32, #tpu.memory_space<vmem>>, vector<1x8x128xf32>
    %63 = vector.shape_cast %62 : vector<1x8x128xf32> to vector<8x128xf32>
    %64 = vector.extract_strided_slice %63 {offsets = [0, 0], sizes = [1, 32], strides = [1, 1]} : vector<8x128xf32> to vector<1x32xf32>
    %65 = vector.extract_strided_slice %63 {offsets = [1, 0], sizes = [1, 32], strides = [1, 1]} : vector<8x128xf32> to vector<1x32xf32>
    %cst_26 = arith.constant dense<0.000000e+00> : vector<10xf32>
    %66 = vector.multi_reduction <add>, %57, %cst_26 [1] : vector<10x32xf32> to vector<10xf32>
    %67 = vector.shape_cast %66 : vector<10xf32> to vector<10x1xf32>
    %cst_27 = arith.constant 3.200000e+01 : f32
    %68 = vector.broadcast %cst_27 : f32 to vector<10x1xf32>
    %69 = arith.divf %67, %68 : vector<10x1xf32>
    %70 = vector.broadcast %69 : vector<10x1xf32> to vector<10x32xf32>
    %71 = arith.subf %57, %70 : vector<10x32xf32>
    %72 = vector.broadcast %69 : vector<10x1xf32> to vector<10x32xf32>
    %73 = arith.subf %57, %72 : vector<10x32xf32>
    %74 = arith.mulf %71, %73 : vector<10x32xf32>
    %cst_28 = arith.constant dense<0.000000e+00> : vector<10xf32>
    %75 = vector.multi_reduction <add>, %74, %cst_28 [1] : vector<10x32xf32> to vector<10xf32>
    %76 = vector.shape_cast %75 : vector<10xf32> to vector<10x1xf32>
    %cst_29 = arith.constant 3.200000e+01 : f32
    %77 = vector.broadcast %cst_29 : f32 to vector<10x1xf32>
    %78 = arith.divf %76, %77 : vector<10x1xf32>
    %79 = vector.broadcast %69 : vector<10x1xf32> to vector<10x32xf32>
    %80 = arith.subf %57, %79 : vector<10x32xf32>
    %cst_30 = arith.constant 9.99999974E-6 : f32
    %81 = vector.broadcast %cst_30 : f32 to vector<10x1xf32>
    %82 = arith.addf %78, %81 : vector<10x1xf32>
    %83 = math.rsqrt %82 : vector<10x1xf32>
    %84 = vector.broadcast %83 : vector<10x1xf32> to vector<10x32xf32>
    %85 = arith.mulf %80, %84 : vector<10x32xf32>
    %86 = vector.broadcast %64 : vector<1x32xf32> to vector<10x32xf32>
    %87 = arith.mulf %85, %86 : vector<10x32xf32>
    %88 = vector.broadcast %65 : vector<1x32xf32> to vector<10x32xf32>
    %89 = arith.addf %87, %88 : vector<10x32xf32>
    %90 = vector.extract_strided_slice %59 {offsets = [0, 0], sizes = [32, 96], strides = [1, 1]} : vector<32x384xf32> to vector<32x96xf32>
    %cst_31 = arith.constant dense<0.000000e+00> : vector<10x96xf32>
    %91 = tpu.matmul %89, %90, %cst_31 {dimension_numbers = #tpu.dot_dimension_numbers<[1], [0], [0], [1], [0, 0, 1, 1], [], []>} : vector<10x32xf32>, vector<32x96xf32>, vector<10x96xf32> -> vector<10x96xf32>
    %92 = vector.extract_strided_slice %63 {offsets = [4, 0], sizes = [1, 96], strides = [1, 1]} : vector<8x128xf32> to vector<1x96xf32>
    %93 = vector.broadcast %92 : vector<1x96xf32> to vector<10x96xf32>
    %94 = arith.addf %91, %93 : vector<10x96xf32>
    %95 = vector.extract_strided_slice %63 {offsets = [5, 0], sizes = [1, 32], strides = [1, 1]} : vector<8x128xf32> to vector<1x32xf32>
    %96 = vector.extract_strided_slice %94 {offsets = [0, 0], sizes = [10, 16], strides = [1, 1]} : vector<10x96xf32> to vector<10x16xf32>
    %97 = vector.extract_strided_slice %94 {offsets = [0, 32], sizes = [10, 16], strides = [1, 1]} : vector<10x96xf32> to vector<10x16xf32>
    %98 = vector.extract_strided_slice %94 {offsets = [0, 64], sizes = [10, 16], strides = [1, 1]} : vector<10x96xf32> to vector<10x16xf32>
    "tpu.trace_start"() <{level = 10 : i32, message = "qe,ke->qk"}> : () -> ()
    %cst_32 = arith.constant dense<0.000000e+00> : vector<10x10xf32>
    %99 = tpu.matmul %96, %97, %cst_32 {dimension_numbers = #tpu.dot_dimension_numbers<[1], [1], [0], [0], [0, 0, 1, 0], [], []>} : vector<10x16xf32>, vector<10x16xf32>, vector<10x10xf32> -> vector<10x10xf32>
    %cst_33 = arith.constant -1.000000e+30 : f32
    "tpu.trace_stop"() : () -> ()
    %100 = vector.broadcast %cst_33 : f32 to vector<10x10xf32>
    %101 = arith.select %26, %99, %100 : vector<10x10xi1>, vector<10x10xf32>
    %cst_34 = arith.constant dense<0xFF800000> : vector<10xf32>
    %102 = vector.multi_reduction <maximumf>, %101, %cst_34 [1] : vector<10x10xf32> to vector<10xf32>
    %103 = vector.shape_cast %102 : vector<10xf32> to vector<10x1xf32>
    %104 = vector.broadcast %103 : vector<10x1xf32> to vector<10x10xf32>
    %105 = arith.subf %101, %104 : vector<10x10xf32>
    %106 = math.exp %105 : vector<10x10xf32>
    %cst_35 = arith.constant dense<0.000000e+00> : vector<10xf32>
    %107 = vector.multi_reduction <add>, %106, %cst_35 [1] : vector<10x10xf32> to vector<10xf32>
    %108 = vector.shape_cast %107 : vector<10xf32> to vector<10x1xf32>
    %109 = tpu.reciprocal %108 {approx = true} : vector<10x1xf32> -> vector<10x1xf32>
    %110 = vector.broadcast %109 : vector<10x1xf32> to vector<10x10xf32>
    %111 = arith.mulf %106, %110 : vector<10x10xf32>
    %cst_36 = arith.constant dense<0.000000e+00> : vector<10x16xf32>
    %112 = tpu.matmul %111, %98, %cst_36 {dimension_numbers = #tpu.dot_dimension_numbers<[1], [0], [0], [1], [0, 0, 1, 1], [], []>} : vector<10x10xf32>, vector<10x16xf32>, vector<10x16xf32> -> vector<10x16xf32>
    %113 = vector.extract_strided_slice %59 {offsets = [0, 128], sizes = [16, 32], strides = [1, 1]} : vector<32x384xf32> to vector<16x32xf32>
    %cst_37 = arith.constant dense<0.000000e+00> : vector<10x32xf32>
    %114 = tpu.matmul %112, %113, %cst_37 {dimension_numbers = #tpu.dot_dimension_numbers<[1], [0], [0], [1], [0, 0, 1, 1], [], []>} : vector<10x16xf32>, vector<16x32xf32>, vector<10x32xf32> -> vector<10x32xf32>
    %115 = vector.broadcast %95 : vector<1x32xf32> to vector<10x32xf32>
    %116 = arith.addf %115, %114 : vector<10x32xf32>
    %117 = vector.extract_strided_slice %94 {offsets = [0, 16], sizes = [10, 16], strides = [1, 1]} : vector<10x96xf32> to vector<10x16xf32>
    %118 = vector.extract_strided_slice %94 {offsets = [0, 48], sizes = [10, 16], strides = [1, 1]} : vector<10x96xf32> to vector<10x16xf32>
    %119 = vector.extract_strided_slice %94 {offsets = [0, 80], sizes = [10, 16], strides = [1, 1]} : vector<10x96xf32> to vector<10x16xf32>
    "tpu.trace_start"() <{level = 10 : i32, message = "qe,ke->qk"}> : () -> ()
    %cst_38 = arith.constant dense<0.000000e+00> : vector<10x10xf32>
    %120 = tpu.matmul %117, %118, %cst_38 {dimension_numbers = #tpu.dot_dimension_numbers<[1], [1], [0], [0], [0, 0, 1, 0], [], []>} : vector<10x16xf32>, vector<10x16xf32>, vector<10x10xf32> -> vector<10x10xf32>
    %cst_39 = arith.constant -1.000000e+30 : f32
    "tpu.trace_stop"() : () -> ()
    %121 = vector.broadcast %cst_39 : f32 to vector<10x10xf32>
    %122 = arith.select %26, %120, %121 : vector<10x10xi1>, vector<10x10xf32>
    %cst_40 = arith.constant dense<0xFF800000> : vector<10xf32>
    %123 = vector.multi_reduction <maximumf>, %122, %cst_40 [1] : vector<10x10xf32> to vector<10xf32>
    %124 = vector.shape_cast %123 : vector<10xf32> to vector<10x1xf32>
    %125 = vector.broadcast %124 : vector<10x1xf32> to vector<10x10xf32>
    %126 = arith.subf %122, %125 : vector<10x10xf32>
    %127 = math.exp %126 : vector<10x10xf32>
    %cst_41 = arith.constant dense<0.000000e+00> : vector<10xf32>
    %128 = vector.multi_reduction <add>, %127, %cst_41 [1] : vector<10x10xf32> to vector<10xf32>
    %129 = vector.shape_cast %128 : vector<10xf32> to vector<10x1xf32>
    %130 = tpu.reciprocal %129 {approx = true} : vector<10x1xf32> -> vector<10x1xf32>
    %131 = vector.broadcast %130 : vector<10x1xf32> to vector<10x10xf32>
    %132 = arith.mulf %127, %131 : vector<10x10xf32>
    %cst_42 = arith.constant dense<0.000000e+00> : vector<10x16xf32>
    %133 = tpu.matmul %132, %119, %cst_42 {dimension_numbers = #tpu.dot_dimension_numbers<[1], [0], [0], [1], [0, 0, 1, 1], [], []>} : vector<10x10xf32>, vector<10x16xf32>, vector<10x16xf32> -> vector<10x16xf32>
    %134 = vector.extract_strided_slice %59 {offsets = [16, 128], sizes = [16, 32], strides = [1, 1]} : vector<32x384xf32> to vector<16x32xf32>
    %cst_43 = arith.constant dense<0.000000e+00> : vector<10x32xf32>
    %135 = tpu.matmul %133, %134, %cst_43 {dimension_numbers = #tpu.dot_dimension_numbers<[1], [0], [0], [1], [0, 0, 1, 1], [], []>} : vector<10x16xf32>, vector<16x32xf32>, vector<10x32xf32> -> vector<10x32xf32>
    %136 = arith.addf %116, %135 : vector<10x32xf32>
    %137 = arith.addf %57, %136 : vector<10x32xf32>
    %138 = vector.extract_strided_slice %63 {offsets = [2, 0], sizes = [1, 32], strides = [1, 1]} : vector<8x128xf32> to vector<1x32xf32>
    %139 = vector.extract_strided_slice %63 {offsets = [3, 0], sizes = [1, 32], strides = [1, 1]} : vector<8x128xf32> to vector<1x32xf32>
    %cst_44 = arith.constant dense<0.000000e+00> : vector<10xf32>
    %140 = vector.multi_reduction <add>, %137, %cst_44 [1] : vector<10x32xf32> to vector<10xf32>
    %141 = vector.shape_cast %140 : vector<10xf32> to vector<10x1xf32>
    %cst_45 = arith.constant 3.200000e+01 : f32
    %142 = vector.broadcast %cst_45 : f32 to vector<10x1xf32>
    %143 = arith.divf %141, %142 : vector<10x1xf32>
    %144 = vector.broadcast %143 : vector<10x1xf32> to vector<10x32xf32>
    %145 = arith.subf %137, %144 : vector<10x32xf32>
    %146 = vector.broadcast %143 : vector<10x1xf32> to vector<10x32xf32>
    %147 = arith.subf %137, %146 : vector<10x32xf32>
    %148 = arith.mulf %145, %147 : vector<10x32xf32>
    %cst_46 = arith.constant dense<0.000000e+00> : vector<10xf32>
    %149 = vector.multi_reduction <add>, %148, %cst_46 [1] : vector<10x32xf32> to vector<10xf32>
    %150 = vector.shape_cast %149 : vector<10xf32> to vector<10x1xf32>
    %cst_47 = arith.constant 3.200000e+01 : f32
    %151 = vector.broadcast %cst_47 : f32 to vector<10x1xf32>
    %152 = arith.divf %150, %151 : vector<10x1xf32>
    %153 = vector.broadcast %143 : vector<10x1xf32> to vector<10x32xf32>
    %154 = arith.subf %137, %153 : vector<10x32xf32>
    %cst_48 = arith.constant 9.99999974E-6 : f32
    %155 = vector.broadcast %cst_48 : f32 to vector<10x1xf32>
    %156 = arith.addf %152, %155 : vector<10x1xf32>
    %157 = math.rsqrt %156 : vector<10x1xf32>
    %158 = vector.broadcast %157 : vector<10x1xf32> to vector<10x32xf32>
    %159 = arith.mulf %154, %158 : vector<10x32xf32>
    %160 = vector.broadcast %138 : vector<1x32xf32> to vector<10x32xf32>
    %161 = arith.mulf %159, %160 : vector<10x32xf32>
    %162 = vector.broadcast %139 : vector<1x32xf32> to vector<10x32xf32>
    %163 = arith.addf %161, %162 : vector<10x32xf32>
    %164 = vector.extract_strided_slice %59 {offsets = [0, 256], sizes = [32, 64], strides = [1, 1]} : vector<32x384xf32> to vector<32x64xf32>
    %cst_49 = arith.constant dense<0.000000e+00> : vector<10x64xf32>
    %165 = tpu.matmul %163, %164, %cst_49 {dimension_numbers = #tpu.dot_dimension_numbers<[1], [0], [0], [1], [0, 0, 1, 1], [], []>} : vector<10x32xf32>, vector<32x64xf32>, vector<10x64xf32> -> vector<10x64xf32>
    %166 = vector.extract_strided_slice %63 {offsets = [6, 0], sizes = [1, 64], strides = [1, 1]} : vector<8x128xf32> to vector<1x64xf32>
    %167 = vector.broadcast %166 : vector<1x64xf32> to vector<10x64xf32>
    %168 = arith.addf %165, %167 : vector<10x64xf32>
    %cst_50 = arith.constant 1.702000e+00 : f32
    %169 = vector.broadcast %cst_50 : f32 to vector<10x64xf32>
    %170 = arith.mulf %169, %168 : vector<10x64xf32>
    %171 = arith.negf %170 : vector<10x64xf32>
    %172 = math.exp %171 : vector<10x64xf32>
    %cst_51 = arith.constant 1.000000e+00 : f32
    %173 = vector.broadcast %cst_51 : f32 to vector<10x64xf32>
    %174 = arith.addf %173, %172 : vector<10x64xf32>
    %175 = arith.divf %173, %174 : vector<10x64xf32>
    %176 = arith.mulf %168, %175 : vector<10x64xf32>
    %cst_52 = arith.constant dense<0.000000e+00> : vector<10x32xf32>
    %177 = tpu.matmul %176, %61, %cst_52 {dimension_numbers = #tpu.dot_dimension_numbers<[1], [0], [0], [1], [0, 0, 1, 1], [], []>} : vector<10x64xf32>, vector<64x32xf32>, vector<10x32xf32> -> vector<10x32xf32>
    %178 = vector.extract_strided_slice %63 {offsets = [7, 0], sizes = [1, 32], strides = [1, 1]} : vector<8x128xf32> to vector<1x32xf32>
    %179 = vector.broadcast %178 : vector<1x32xf32> to vector<10x32xf32>
    %180 = arith.addf %177, %179 : vector<10x32xf32>
    %181 = arith.addf %137, %180 : vector<10x32xf32>
    %c1 = arith.constant 1 : index
    %c0_53 = arith.constant 0 : index
    %c0_54 = arith.constant 0 : index
    %182 = vector.load %arg4[%c1, %c0_53, %c0_54] : memref<2x32x384xf32, #tpu.memory_space<vmem>>, vector<1x32x384xf32>
    %183 = vector.shape_cast %182 : vector<1x32x384xf32> to vector<32x384xf32>
    %c1_55 = arith.constant 1 : index
    %c0_56 = arith.constant 0 : index
    %c0_57 = arith.constant 0 : index
    %184 = vector.load %arg5[%c1_55, %c0_56, %c0_57] : memref<2x64x32xf32, #tpu.memory_space<vmem>>, vector<1x64x32xf32>
    %185 = vector.shape_cast %184 : vector<1x64x32xf32> to vector<64x32xf32>
    %c1_58 = arith.constant 1 : index
    %c0_59 = arith.constant 0 : index
    %c0_60 = arith.constant 0 : index
    %186 = vector.load %arg6[%c1_58, %c0_59, %c0_60] : memref<2x8x128xf32, #tpu.memory_space<vmem>>, vector<1x8x128xf32>
    %187 = vector.shape_cast %186 : vector<1x8x128xf32> to vector<8x128xf32>
    %188 = vector.extract_strided_slice %187 {offsets = [0, 0], sizes = [1, 32], strides = [1, 1]} : vector<8x128xf32> to vector<1x32xf32>
    %189 = vector.extract_strided_slice %187 {offsets = [1, 0], sizes = [1, 32], strides = [1, 1]} : vector<8x128xf32> to vector<1x32xf32>
    %cst_61 = arith.constant dense<0.000000e+00> : vector<10xf32>
    %190 = vector.multi_reduction <add>, %181, %cst_61 [1] : vector<10x32xf32> to vector<10xf32>
    %191 = vector.shape_cast %190 : vector<10xf32> to vector<10x1xf32>
    %cst_62 = arith.constant 3.200000e+01 : f32
    %192 = vector.broadcast %cst_62 : f32 to vector<10x1xf32>
    %193 = arith.divf %191, %192 : vector<10x1xf32>
    %194 = vector.broadcast %193 : vector<10x1xf32> to vector<10x32xf32>
    %195 = arith.subf %181, %194 : vector<10x32xf32>
    %196 = vector.broadcast %193 : vector<10x1xf32> to vector<10x32xf32>
    %197 = arith.subf %181, %196 : vector<10x32xf32>
    %198 = arith.mulf %195, %197 : vector<10x32xf32>
    %cst_63 = arith.constant dense<0.000000e+00> : vector<10xf32>
    %199 = vector.multi_reduction <add>, %198, %cst_63 [1] : vector<10x32xf32> to vector<10xf32>
    %200 = vector.shape_cast %199 : vector<10xf32> to vector<10x1xf32>
    %cst_64 = arith.constant 3.200000e+01 : f32
    %201 = vector.broadcast %cst_64 : f32 to vector<10x1xf32>
    %202 = arith.divf %200, %201 : vector<10x1xf32>
    %203 = vector.broadcast %193 : vector<10x1xf32> to vector<10x32xf32>
    %204 = arith.subf %181, %203 : vector<10x32xf32>
    %cst_65 = arith.constant 9.99999974E-6 : f32
    %205 = vector.broadcast %cst_65 : f32 to vector<10x1xf32>
    %206 = arith.addf %202, %205 : vector<10x1xf32>
    %207 = math.rsqrt %206 : vector<10x1xf32>
    %208 = vector.broadcast %207 : vector<10x1xf32> to vector<10x32xf32>
    %209 = arith.mulf %204, %208 : vector<10x32xf32>
    %210 = vector.broadcast %188 : vector<1x32xf32> to vector<10x32xf32>
    %211 = arith.mulf %209, %210 : vector<10x32xf32>
    %212 = vector.broadcast %189 : vector<1x32xf32> to vector<10x32xf32>
    %213 = arith.addf %211, %212 : vector<10x32xf32>
    %214 = vector.extract_strided_slice %183 {offsets = [0, 0], sizes = [32, 96], strides = [1, 1]} : vector<32x384xf32> to vector<32x96xf32>
    %cst_66 = arith.constant dense<0.000000e+00> : vector<10x96xf32>
    %215 = tpu.matmul %213, %214, %cst_66 {dimension_numbers = #tpu.dot_dimension_numbers<[1], [0], [0], [1], [0, 0, 1, 1], [], []>} : vector<10x32xf32>, vector<32x96xf32>, vector<10x96xf32> -> vector<10x96xf32>
    %216 = vector.extract_strided_slice %187 {offsets = [4, 0], sizes = [1, 96], strides = [1, 1]} : vector<8x128xf32> to vector<1x96xf32>
    %217 = vector.broadcast %216 : vector<1x96xf32> to vector<10x96xf32>
    %218 = arith.addf %215, %217 : vector<10x96xf32>
    %219 = vector.extract_strided_slice %187 {offsets = [5, 0], sizes = [1, 32], strides = [1, 1]} : vector<8x128xf32> to vector<1x32xf32>
    %220 = vector.extract_strided_slice %218 {offsets = [0, 0], sizes = [10, 16], strides = [1, 1]} : vector<10x96xf32> to vector<10x16xf32>
    %221 = vector.extract_strided_slice %218 {offsets = [0, 32], sizes = [10, 16], strides = [1, 1]} : vector<10x96xf32> to vector<10x16xf32>
    %222 = vector.extract_strided_slice %218 {offsets = [0, 64], sizes = [10, 16], strides = [1, 1]} : vector<10x96xf32> to vector<10x16xf32>
    "tpu.trace_start"() <{level = 10 : i32, message = "qe,ke->qk"}> : () -> ()
    %cst_67 = arith.constant dense<0.000000e+00> : vector<10x10xf32>
    %223 = tpu.matmul %220, %221, %cst_67 {dimension_numbers = #tpu.dot_dimension_numbers<[1], [1], [0], [0], [0, 0, 1, 0], [], []>} : vector<10x16xf32>, vector<10x16xf32>, vector<10x10xf32> -> vector<10x10xf32>
    %cst_68 = arith.constant -1.000000e+30 : f32
    "tpu.trace_stop"() : () -> ()
    %224 = vector.broadcast %cst_68 : f32 to vector<10x10xf32>
    %225 = arith.select %26, %223, %224 : vector<10x10xi1>, vector<10x10xf32>
    %cst_69 = arith.constant dense<0xFF800000> : vector<10xf32>
    %226 = vector.multi_reduction <maximumf>, %225, %cst_69 [1] : vector<10x10xf32> to vector<10xf32>
    %227 = vector.shape_cast %226 : vector<10xf32> to vector<10x1xf32>
    %228 = vector.broadcast %227 : vector<10x1xf32> to vector<10x10xf32>
    %229 = arith.subf %225, %228 : vector<10x10xf32>
    %230 = math.exp %229 : vector<10x10xf32>
    %cst_70 = arith.constant dense<0.000000e+00> : vector<10xf32>
    %231 = vector.multi_reduction <add>, %230, %cst_70 [1] : vector<10x10xf32> to vector<10xf32>
    %232 = vector.shape_cast %231 : vector<10xf32> to vector<10x1xf32>
    %233 = tpu.reciprocal %232 {approx = true} : vector<10x1xf32> -> vector<10x1xf32>
    %234 = vector.broadcast %233 : vector<10x1xf32> to vector<10x10xf32>
    %235 = arith.mulf %230, %234 : vector<10x10xf32>
    %cst_71 = arith.constant dense<0.000000e+00> : vector<10x16xf32>
    %236 = tpu.matmul %235, %222, %cst_71 {dimension_numbers = #tpu.dot_dimension_numbers<[1], [0], [0], [1], [0, 0, 1, 1], [], []>} : vector<10x10xf32>, vector<10x16xf32>, vector<10x16xf32> -> vector<10x16xf32>
    %237 = vector.extract_strided_slice %183 {offsets = [0, 128], sizes = [16, 32], strides = [1, 1]} : vector<32x384xf32> to vector<16x32xf32>
    %cst_72 = arith.constant dense<0.000000e+00> : vector<10x32xf32>
    %238 = tpu.matmul %236, %237, %cst_72 {dimension_numbers = #tpu.dot_dimension_numbers<[1], [0], [0], [1], [0, 0, 1, 1], [], []>} : vector<10x16xf32>, vector<16x32xf32>, vector<10x32xf32> -> vector<10x32xf32>
    %239 = vector.broadcast %219 : vector<1x32xf32> to vector<10x32xf32>
    %240 = arith.addf %239, %238 : vector<10x32xf32>
    %241 = vector.extract_strided_slice %218 {offsets = [0, 16], sizes = [10, 16], strides = [1, 1]} : vector<10x96xf32> to vector<10x16xf32>
    %242 = vector.extract_strided_slice %218 {offsets = [0, 48], sizes = [10, 16], strides = [1, 1]} : vector<10x96xf32> to vector<10x16xf32>
    %243 = vector.extract_strided_slice %218 {offsets = [0, 80], sizes = [10, 16], strides = [1, 1]} : vector<10x96xf32> to vector<10x16xf32>
    "tpu.trace_start"() <{level = 10 : i32, message = "qe,ke->qk"}> : () -> ()
    %cst_73 = arith.constant dense<0.000000e+00> : vector<10x10xf32>
    %244 = tpu.matmul %241, %242, %cst_73 {dimension_numbers = #tpu.dot_dimension_numbers<[1], [1], [0], [0], [0, 0, 1, 0], [], []>} : vector<10x16xf32>, vector<10x16xf32>, vector<10x10xf32> -> vector<10x10xf32>
    %cst_74 = arith.constant -1.000000e+30 : f32
    "tpu.trace_stop"() : () -> ()
    %245 = vector.broadcast %cst_74 : f32 to vector<10x10xf32>
    %246 = arith.select %26, %244, %245 : vector<10x10xi1>, vector<10x10xf32>
    %cst_75 = arith.constant dense<0xFF800000> : vector<10xf32>
    %247 = vector.multi_reduction <maximumf>, %246, %cst_75 [1] : vector<10x10xf32> to vector<10xf32>
    %248 = vector.shape_cast %247 : vector<10xf32> to vector<10x1xf32>
    %249 = vector.broadcast %248 : vector<10x1xf32> to vector<10x10xf32>
    %250 = arith.subf %246, %249 : vector<10x10xf32>
    %251 = math.exp %250 : vector<10x10xf32>
    %cst_76 = arith.constant dense<0.000000e+00> : vector<10xf32>
    %252 = vector.multi_reduction <add>, %251, %cst_76 [1] : vector<10x10xf32> to vector<10xf32>
    %253 = vector.shape_cast %252 : vector<10xf32> to vector<10x1xf32>
    %254 = tpu.reciprocal %253 {approx = true} : vector<10x1xf32> -> vector<10x1xf32>
    %255 = vector.broadcast %254 : vector<10x1xf32> to vector<10x10xf32>
    %256 = arith.mulf %251, %255 : vector<10x10xf32>
    %cst_77 = arith.constant dense<0.000000e+00> : vector<10x16xf32>
    %257 = tpu.matmul %256, %243, %cst_77 {dimension_numbers = #tpu.dot_dimension_numbers<[1], [0], [0], [1], [0, 0, 1, 1], [], []>} : vector<10x10xf32>, vector<10x16xf32>, vector<10x16xf32> -> vector<10x16xf32>
    %258 = vector.extract_strided_slice %183 {offsets = [16, 128], sizes = [16, 32], strides = [1, 1]} : vector<32x384xf32> to vector<16x32xf32>
    %cst_78 = arith.constant dense<0.000000e+00> : vector<10x32xf32>
    %259 = tpu.matmul %257, %258, %cst_78 {dimension_numbers = #tpu.dot_dimension_numbers<[1], [0], [0], [1], [0, 0, 1, 1], [], []>} : vector<10x16xf32>, vector<16x32xf32>, vector<10x32xf32> -> vector<10x32xf32>
    %260 = arith.addf %240, %259 : vector<10x32xf32>
    %261 = arith.addf %181, %260 : vector<10x32xf32>
    %262 = vector.extract_strided_slice %187 {offsets = [2, 0], sizes = [1, 32], strides = [1, 1]} : vector<8x128xf32> to vector<1x32xf32>
    %263 = vector.extract_strided_slice %187 {offsets = [3, 0], sizes = [1, 32], strides = [1, 1]} : vector<8x128xf32> to vector<1x32xf32>
    %cst_79 = arith.constant dense<0.000000e+00> : vector<10xf32>
    %264 = vector.multi_reduction <add>, %261, %cst_79 [1] : vector<10x32xf32> to vector<10xf32>
    %265 = vector.shape_cast %264 : vector<10xf32> to vector<10x1xf32>
    %cst_80 = arith.constant 3.200000e+01 : f32
    %266 = vector.broadcast %cst_80 : f32 to vector<10x1xf32>
    %267 = arith.divf %265, %266 : vector<10x1xf32>
    %268 = vector.broadcast %267 : vector<10x1xf32> to vector<10x32xf32>
    %269 = arith.subf %261, %268 : vector<10x32xf32>
    %270 = vector.broadcast %267 : vector<10x1xf32> to vector<10x32xf32>
    %271 = arith.subf %261, %270 : vector<10x32xf32>
    %272 = arith.mulf %269, %271 : vector<10x32xf32>
    %cst_81 = arith.constant dense<0.000000e+00> : vector<10xf32>
    %273 = vector.multi_reduction <add>, %272, %cst_81 [1] : vector<10x32xf32> to vector<10xf32>
    %274 = vector.shape_cast %273 : vector<10xf32> to vector<10x1xf32>
    %cst_82 = arith.constant 3.200000e+01 : f32
    %275 = vector.broadcast %cst_82 : f32 to vector<10x1xf32>
    %276 = arith.divf %274, %275 : vector<10x1xf32>
    %277 = vector.broadcast %267 : vector<10x1xf32> to vector<10x32xf32>
    %278 = arith.subf %261, %277 : vector<10x32xf32>
    %cst_83 = arith.constant 9.99999974E-6 : f32
    %279 = vector.broadcast %cst_83 : f32 to vector<10x1xf32>
    %280 = arith.addf %276, %279 : vector<10x1xf32>
    %281 = math.rsqrt %280 : vector<10x1xf32>
    %282 = vector.broadcast %281 : vector<10x1xf32> to vector<10x32xf32>
    %283 = arith.mulf %278, %282 : vector<10x32xf32>
    %284 = vector.broadcast %262 : vector<1x32xf32> to vector<10x32xf32>
    %285 = arith.mulf %283, %284 : vector<10x32xf32>
    %286 = vector.broadcast %263 : vector<1x32xf32> to vector<10x32xf32>
    %287 = arith.addf %285, %286 : vector<10x32xf32>
    %288 = vector.extract_strided_slice %183 {offsets = [0, 256], sizes = [32, 64], strides = [1, 1]} : vector<32x384xf32> to vector<32x64xf32>
    %cst_84 = arith.constant dense<0.000000e+00> : vector<10x64xf32>
    %289 = tpu.matmul %287, %288, %cst_84 {dimension_numbers = #tpu.dot_dimension_numbers<[1], [0], [0], [1], [0, 0, 1, 1], [], []>} : vector<10x32xf32>, vector<32x64xf32>, vector<10x64xf32> -> vector<10x64xf32>
    %290 = vector.extract_strided_slice %187 {offsets = [6, 0], sizes = [1, 64], strides = [1, 1]} : vector<8x128xf32> to vector<1x64xf32>
    %291 = vector.broadcast %290 : vector<1x64xf32> to vector<10x64xf32>
    %292 = arith.addf %289, %291 : vector<10x64xf32>
    %cst_85 = arith.constant 1.702000e+00 : f32
    %293 = vector.broadcast %cst_85 : f32 to vector<10x64xf32>
    %294 = arith.mulf %293, %292 : vector<10x64xf32>
    %295 = arith.negf %294 : vector<10x64xf32>
    %296 = math.exp %295 : vector<10x64xf32>
    %cst_86 = arith.constant 1.000000e+00 : f32
    %297 = vector.broadcast %cst_86 : f32 to vector<10x64xf32>
    %298 = arith.addf %297, %296 : vector<10x64xf32>
    %299 = arith.divf %297, %298 : vector<10x64xf32>
    %300 = arith.mulf %292, %299 : vector<10x64xf32>
    %cst_87 = arith.constant dense<0.000000e+00> : vector<10x32xf32>
    %301 = tpu.matmul %300, %185, %cst_87 {dimension_numbers = #tpu.dot_dimension_numbers<[1], [0], [0], [1], [0, 0, 1, 1], [], []>} : vector<10x64xf32>, vector<64x32xf32>, vector<10x32xf32> -> vector<10x32xf32>
    %302 = vector.extract_strided_slice %187 {offsets = [7, 0], sizes = [1, 32], strides = [1, 1]} : vector<8x128xf32> to vector<1x32xf32>
    %303 = vector.broadcast %302 : vector<1x32xf32> to vector<10x32xf32>
    %304 = arith.addf %301, %303 : vector<10x32xf32>
    %305 = arith.addf %261, %304 : vector<10x32xf32>
    %c12 = arith.constant 12 : index
    %c0_88 = arith.constant 0 : index
    %306 = vector.load %arg2[%c12, %c0_88] : memref<14x32xf32, #tpu.memory_space<vmem>>, vector<1x32xf32>
    %c13 = arith.constant 13 : index
    %c0_89 = arith.constant 0 : index
    %307 = vector.load %arg2[%c13, %c0_89] : memref<14x32xf32, #tpu.memory_space<vmem>>, vector<1x32xf32>
    %cst_90 = arith.constant dense<0.000000e+00> : vector<10xf32>
    %308 = vector.multi_reduction <add>, %305, %cst_90 [1] : vector<10x32xf32> to vector<10xf32>
    %309 = vector.shape_cast %308 : vector<10xf32> to vector<10x1xf32>
    %cst_91 = arith.constant 3.200000e+01 : f32
    %310 = vector.broadcast %cst_91 : f32 to vector<10x1xf32>
    %311 = arith.divf %309, %310 : vector<10x1xf32>
    %312 = vector.broadcast %311 : vector<10x1xf32> to vector<10x32xf32>
    %313 = arith.subf %305, %312 : vector<10x32xf32>
    %314 = vector.broadcast %311 : vector<10x1xf32> to vector<10x32xf32>
    %315 = arith.subf %305, %314 : vector<10x32xf32>
    %316 = arith.mulf %313, %315 : vector<10x32xf32>
    %cst_92 = arith.constant dense<0.000000e+00> : vector<10xf32>
    %317 = vector.multi_reduction <add>, %316, %cst_92 [1] : vector<10x32xf32> to vector<10xf32>
    %318 = vector.shape_cast %317 : vector<10xf32> to vector<10x1xf32>
    %cst_93 = arith.constant 3.200000e+01 : f32
    %319 = vector.broadcast %cst_93 : f32 to vector<10x1xf32>
    %320 = arith.divf %318, %319 : vector<10x1xf32>
    %321 = vector.broadcast %311 : vector<10x1xf32> to vector<10x32xf32>
    %322 = arith.subf %305, %321 : vector<10x32xf32>
    %cst_94 = arith.constant 9.99999974E-6 : f32
    %323 = vector.broadcast %cst_94 : f32 to vector<10x1xf32>
    %324 = arith.addf %320, %323 : vector<10x1xf32>
    %325 = math.rsqrt %324 : vector<10x1xf32>
    %326 = vector.broadcast %325 : vector<10x1xf32> to vector<10x32xf32>
    %327 = arith.mulf %322, %326 : vector<10x32xf32>
    %328 = vector.broadcast %306 : vector<1x32xf32> to vector<10x32xf32>
    %329 = arith.mulf %327, %328 : vector<10x32xf32>
    %330 = vector.broadcast %307 : vector<1x32xf32> to vector<10x32xf32>
    %331 = arith.addf %329, %330 : vector<10x32xf32>
    %c0_95 = arith.constant 0 : index
    %c0_96 = arith.constant 0 : index
    %332 = vector.load %arg3[%c0_95, %c0_96] : memref<32x128xf32, #tpu.memory_space<vmem>>, vector<32x128xf32>
    %cst_97 = arith.constant dense<0.000000e+00> : vector<10x128xf32>
    %333 = tpu.matmul %331, %332, %cst_97 {dimension_numbers = #tpu.dot_dimension_numbers<[1], [0], [0], [1], [0, 0, 1, 1], [], []>} : vector<10x32xf32>, vector<32x128xf32>, vector<10x128xf32> -> vector<10x128xf32>
    %c0_98 = arith.constant 0 : index
    %c0_99 = arith.constant 0 : index
    %334 = vector.load %arg7[%c0_98, %c0_99] : memref<10x128xf32, #tpu.memory_space<vmem>>, vector<10x128xf32>
    tpu.vector_store %arg7[%c0_98, %c0_99], %333 {strides = array<i32>} : memref<10x128xf32, #tpu.memory_space<vmem>>, vector<10x128xf32>,
    return
  }
}

</mosaic_0001>

<bundles_post_ra>
// kernel: open_clip_vision_encoder_forward.1
= control target key start
LH: loop header
LB: loop body
LE: loop exit
PB: predicated region body
PF: predicated region fallthrough
CT: control target
= control target key end

     0   :  { %v2676_v0 = vmov 0.0   ;;  %vm3285_vm0 = vcmask 523264   ;;  %vm3286_vm1 = vcmask 261120   ;;  %vm175_vm2 = vcmask 254976   ;;  %s2677_s27 = smov 96   ;;  %s2678_s28 = smov 64   ;;  %s3277_s1 = inlined_call_operand.vmem [shape: f32[192,32], index: 1, kind: input, shape index: {}]   ;;  %s3278_s0 = inlined_call_operand.vmem [shape: f32[10,192], index: 0, kind: input, shape index: {}]   ;;  %s3279_s2 = inlined_call_operand.vmem [shape: f32[14,32], index: 2, kind: input, shape index: {}]   ;;  %s3280_s4 = inlined_call_operand.vmem [shape: f32[2,32,384], index: 4, kind: input, shape index: {}]   ;;  %s3281_s6 = inlined_call_operand.vmem [shape: f32[2,8,128], index: 6, kind: input, shape index: {}]   ;;  %s3282_s5 = inlined_call_operand.vmem [shape: f32[2,64,32], index: 5, kind: input, shape index: {}]   ;;  %s3283_s3 = inlined_call_operand.vmem [shape: f32[32,128], index: 3, kind: input, shape index: {}]   ;;  %s3284_s7 = inlined_call_operand.vmem [shape: f32[10,128], index: 7, kind: output, shape index: {}]  }
   0x1   :  { %94 = vmatprep.subr.mxu0 %v2676_v0  ;;  %v76_v1 = vld [vmem:[%s3277_s1 + $0x78] sm:$0xff]  ;;  %v75_v2 = vld [vmem:[%s3277_s1 + $0x70] sm:$0xff]  ;;  %v74_v3 = vld [vmem:[%s3277_s1 + $0x68] sm:$0xff]  ;;  %vm362_vm3 = vcmask 130048   ;;  %vm452_vm15 = vcmask 74752   ;;  %s2679_s29 = smov 80  }
   0x2   :  { %95 = vmatpush1.msra.mxu0 %v76_v1  ;;  %v73_v4 = vld [vmem:[%s3277_s1 + $0x60] sm:$0xff]  ;;  %v72_v5 = vld [vmem:[%s3277_s1 + $0x58] sm:$0xff]  ;;  %v71_v6 = vld [vmem:[%s3277_s1 + $0x50] sm:$0xff]  ;;  %s2680_s30 = smov 112   ;;  %s2681_s11 = smov 48  }
   0x3   :  { %96 = vmatprep.subr.mxu0 %v2676_v0  ;;  %v58_v7 = vld [vmem:[%s3278_s0 + $0x8] sm:$0xff]  ;;  %v69_v9 = vld [vmem:[%s3277_s1 + $0x40] sm:$0xff]  ;;  %v68_v10 = vld [vmem:[%s3277_s1 + $0x38] sm:$0xff] }
   0x4   :  { %97 = vmatpush1.msra.mxu0 %v75_v2  ;;  %2242 = vmatprep.mubr.msk.f32.mxu0 %vm3285_vm0, %v58_v7  ;;  %v70_v8 = vld [vmem:[%s3277_s1 + $0x48] sm:$0xff]  ;;  %v67_v11 = vld [vmem:[%s3277_s1 + $0x30] sm:$0xff]  ;;  %v65_v13 = vld [vmem:[%s3277_s1 + $0x20] sm:$0xff] }
   0x5   :  { %98 = vmatprep.subr.mxu0 %v2676_v0  ;;  %v66_v12 = vld [vmem:[%s3277_s1 + $0x28] sm:$0xff]  ;;  %v64_v14 = vld [vmem:[%s3277_s1 + $0x18] sm:$0xff]  ;;  %v63_v15 = vld [vmem:[%s3277_s1 + $0x10] sm:$0xff] }
   0x6   :  { %99 = vmatpush1.msra.mxu0 %v74_v3  ;;  %v62_v16 = vld [vmem:[%s3277_s1 + $0x8] sm:$0xff]  ;;  %v61_v17 = vld [vmem:[%s3277_s1] sm:$0xff]  ;;  %v84_v18 = vld [vmem:[%s3277_s1 + $0xb8] sm:$0xff] }
   0x7   :  { %100 = vmatprep.subr.mxu0 %v2676_v0  ;;  %v83_v19 = vld [vmem:[%s3277_s1 + $0xb0] sm:$0xff]  ;;  %v82_v20 = vld [vmem:[%s3277_s1 + $0xa8] sm:$0xff]  ;;  %v81_v21 = vld [vmem:[%s3277_s1 + $0xa0] sm:$0xff] }
   0x8   :  { %101 = vmatpush1.msra.mxu0 %v73_v4  ;;  %v80_v22 = vld [vmem:[%s3277_s1 + $0x98] sm:$0xff]  ;;  %v79_v23 = vld [vmem:[%s3277_s1 + $0x90] sm:$0xff]  ;;  %v78_v24 = vld [vmem:[%s3277_s1 + $0x88] sm:$0xff] }
   0x9   :  { %102 = vmatprep.subr.mxu0 %v2676_v0  ;;  %v77_v25 = vld [vmem:[%s3277_s1 + $0x80] sm:$0xff]  ;;  %v60_v27 = vld [vmem:[%s3278_s0 + $0x18] sm:$0x3]  ;;  %v59_v28 = vld [vmem:[%s3278_s0 + $0x10] sm:$0x3] }
   0xa   :  { %103 = vmatpush1.msra.mxu0 %v72_v5  ;;  %v57_v26 = vld [vmem:[%s3278_s0] sm:$0xff]  ;;  %v86_v33 = vld [vmem:[%s3279_s2 + $0x8] sm:$0x3]  ;;  %v2244_v56 = vld [vmem:[%s3279_s2 + $0xa] ss:$0 sm:$0xff] }
   0xb   :  { %104 = vmatprep.subr.mxu0 %v2676_v0  ;;  %v85_v29 = vld [vmem:[%s3279_s2] sm:$0xff]  ;;  %v2245_v58 = vld [vmem:[%s3279_s2 + $0xb] ss:$0 sm:$0xff] }
   0xc   :  { %105 = vmatpush1.msra.mxu0 %v71_v6 }
   0xd   :  { %106 = vmatprep.subr.mxu0 %v2676_v0 }
   0xe   :  { %107 = vmatpush1.msra.mxu0 %v70_v8 }
   0xf   :  { %108 = vmatprep.subr.mxu0 %v2676_v0 }
  0x10   :  { %109 = vmatpush1.msra.mxu0 %v69_v9 }
  0x11   :  { %110 = vmatprep.subr.mxu0 %v2676_v0 }
  0x12   :  { %111 = vmatpush1.msra.mxu0 %v68_v10 }
  0x13   :  { %112 = vmatprep.subr.mxu0 %v2676_v0 }
  0x14   :  { %113 = vmatpush1.msra.mxu0 %v67_v11 }
  0x15   :  { %114 = vmatprep.subr.mxu0 %v2676_v0 }
  0x16   :  { %115 = vmatpush1.msra.mxu0 %v66_v12 }
  0x17   :  { %116 = vmatprep.subr.mxu0 %v2676_v0 }
  0x18   :  { %117 = vmatpush1.msra.mxu0 %v65_v13  ;;  %v221_v13 = vld [vmem:[%s3280_s4 + $0x48] sm:$0xff] }
  0x19   :  { %118 = vmatprep.subr.mxu0 %v2676_v0  ;;  %2421 = vmatprep.subr.mxu1 %v221_v13 }
  0x1a   :  { %119 = vmatpush1.msra.mxu0 %v64_v14  ;;  %v218_v14 = vld [vmem:[%s3280_s4 + $0x30] sm:$0xff]  ;;  %2422 = vmatpush3.msra.mxu1 %v221_v13  ;;  %v213_v13 = vld [vmem:[%s3280_s4 + $0x8] sm:$0xff] }
  0x1b   :  { %120 = vmatprep.subr.mxu0 %v2676_v0  ;;  %2423 = vmatprep.subr.mxu1 %v218_v14 }
  0x1c   :  { %121 = vmatpush1.msra.mxu0 %v63_v15  ;;  %v215_v15 = vld [vmem:[%s3280_s4 + $0x18] sm:$0xff]  ;;  %2424 = vmatpush3.msra.mxu1 %v218_v14 }
  0x1d   :  { %122 = vmatprep.subr.mxu0 %v2676_v0  ;;  %2425 = vmatprep.subr.mxu1 %v215_v15 }
  0x1e   :  { %123 = vmatpush1.msra.mxu0 %v62_v16  ;;  %2426 = vmatpush3.msra.mxu1 %v215_v15  ;;  %v212_v16 = vld [vmem:[%s3280_s4] sm:$0xff] }
  0x1f   :  { %124 = vmatprep.subr.mxu0 %v2676_v0  ;;  %2427 = vmatprep.subr.mxu1 %v212_v16 }
  0x20   :  { %125 = vmatpush1.msra.mxu0 %v61_v17  ;;  %2428 = vmatpush3.msra.mxu1 %v212_v16 }
  0x21   :  { %142 = vmatprep.subr.mxu0 %v2676_v0 }
  0x22   :  { %143 = vmatpush2.msra.mxu0 %v84_v18 }
  0x23   :  { %144 = vmatprep.subr.mxu0 %v2676_v0 }
  0x24   :  { %145 = vmatpush2.msra.mxu0 %v83_v19 }
  0x25   :  { %146 = vmatprep.subr.mxu0 %v2676_v0 }
  0x26   :  { %147 = vmatpush2.msra.mxu0 %v82_v20 }
  0x27   :  { %148 = vmatprep.subr.mxu0 %v2676_v0 }
  0x28   :  { %149 = vmatpush2.msra.mxu0 %v81_v21 }
  0x29   :  { %150 = vmatprep.subr.mxu0 %v2676_v0 }
  0x2a   :  { %151 = vmatpush2.msra.mxu0 %v80_v22  ;;  %v26_v22 = vlaneseq }
  0x2b   :  { %152 = vmatprep.subr.mxu0 %v2676_v0 }
  0x2c   :  { %153 = vmatpush2.msra.mxu0 %v79_v23 }
  0x2d   :  { %154 = vmatprep.subr.mxu0 %v2676_v0 }
  0x2e   :  { %155 = vmatpush2.msra.mxu0 %v78_v24  ;;  %v2872_v24 = vshrl.u32 %v26_v22, 7 }
  0x2f   :  { %156 = vmatprep.subr.mxu0 %v2676_v0 }
  0x30   :  { %157 = vmatpush2.msra.mxu0 %v77_v25  ;;  %v261_v25 = vsub.s32 0, %v2872_v24  ;;  %vm43_vm5 = vcmp.ge.s32.totalorder %v2872_v24, 5  ;;  %vm33_vm7 = vcmp.lt.s32.totalorder %v2872_v24, 5 }
  0x31   :  { %159 = vmatmul.mubr.f32.vlgmr.msra.gmra.mxu0 %v57_v26  ;;  %v2878_v26 = vld [vmem:[%s3281_s6] sm:$0xff] }
  0x32   :  { %2243 = vmatprep.mubr.msk.f32.mxu0 %vm3285_vm0, %v60_v27  ;;  %v267_v27 = vsub.s32 1, %v2872_v24 }
  0x35   :  { %164 = vmatmul.mubr.f32.gmra.mxu0 %v59_v28  ;;  %v262_v28 = vrot.slane %v2878_v26, %v261_v25 }
  0xf1   :  { %v160_v30 = vpop.f32.mrf.mxu0 }
  0xf2   :  { %v161_v31 = vadd.f32 %v160_v30, %v85_v29 }
  0xf3   :  { %v162_v32 = vpop.f32.mrf.mxu0 }
  0xf4   :  { %v172_v34 = vsel %vm3286_vm1, %v161_v31, 0.0 }
  0xf5   :  { %v165_v35 = vpop.f32.mrf.mxu0  ;;  %173 = vadd.xlane.f32.xlu0 %v172_v34 }
  0xf6   :  { %v166_v36 = vadd.f32 %v165_v35, %v86_v33 }
  0xf7   :  { %v167_v37 = vpop.f32.mrf.mxu0 }
  0xf8   :  { %v176_v38 = vsel %vm175_vm2, %v166_v36, 0.0 }
  0xf9   :  { %177 = vadd.xlane.f32.xlu0 %v176_v38  ;;  %v273_v38 = vsub.s32 4, %v2872_v24 }
 0x17e   :  { %v174_v39 = vpop.xlane.xlu0 %173 }
 0x17f   :  { %v180_v40 = vmul.f32 0.03125, %v174_v39  ;;  %v274_v39 = vrot.slane %v2878_v26, %v273_v38 }
 0x181   :  { %v182_v41 = vsub.f32 %v161_v31, %v180_v40  ;;  %v268_v31 = vrot.slane %v2878_v26, %v267_v27 }
 0x182   :  { %v178_v42 = vpop.xlane.xlu0 %177 }
 0x183   :  { %v181_v43 = vmul.f32 0.03125, %v178_v42  ;;  %v184_v44 = vmul.f32 %v182_v41, %v182_v41 }
 0x185   :  { %v183_v45 = vsub.f32 %v166_v36, %v181_v43  ;;  %v186_v46 = vsel %vm3286_vm1, %v184_v44, 0.0 }
 0x186   :  { %187 = vadd.xlane.f32.xlu1 %v186_v46  ;;  %v30_v46 = vand.u32 127, %v26_v22 }
 0x187   :  { %v185_v47 = vmul.f32 %v183_v45, %v183_v45 }
 0x188   :  { %vm49_vm4 = vcmp.ge.s32.totalorder %v30_v46, 5  ;;  %vm40_vm8 = vcmp.lt.s32.totalorder %v30_v46, 5  ;;  %vm52_vm9 = vcmp.lt.s32.totalorder %v30_v46, 10 }
 0x189   :  { %v189_v48 = vsel %vm175_vm2, %v185_v47, 0.0  ;;  %v28_v47 = vadd.s32 8, %v2872_v24  ;;  %vm50_vm10 = vmand %vm43_vm5, %vm49_vm4  ;;  %vm3291_vm5 = vcmask 261120  }
 0x18a   :  { %190 = vadd.xlane.f32.xlu1 %v189_v48  ;;  %vm41_vm12 = vmand %vm33_vm7, %vm40_vm8 }
 0x18b   :  { %vm46_vm6 = vcmp.lt.s32.totalorder %v28_v47, 10  ;;  %vm53_vm13 = vmand %vm50_vm10, %vm52_vm9 }
 0x18c   :  { %vm51_vm11 = vmand %vm46_vm6, %vm49_vm4  ;;  %vm483_vm4 = vcmask 1041408  }
 0x18d   :  { %vm2912_vm14 = vmand %vm51_vm11, %vm52_vm9  ;;  %vm3295_vm9 = vcmask 523264  }
 0x18e   :  { %vm2916_vm0 = vmor %vm41_vm12, %vm53_vm13 }
 0x18f   :  { %vm3292_vm6 = vmmov %vm3291_vm5 }
 0x190   :  { %vm3293_vm7 = vmmov %vm3291_vm5 }
 0x191   :  { %vm3294_vm8 = vmmov %vm3291_vm5 }
 0x192   :  { %vm3296_vm10 = vmmov %vm3295_vm9 }
 0x193   :  { %vm3297_vm11 = vmmov %vm3291_vm5 }
 0x194   :  { %vm3298_vm12 = vmmov %vm3291_vm5 }
 0x195   :  { %vm3299_vm13 = vmmov %vm3291_vm5 }
 0x20f   :  { %v188_v49 = vpop.xlane.xlu1 %187 }
 0x210   :  { %v192_v50 = vmul.f32 0.03125, %v188_v49 }
 0x212   :  { %v194_v51 = vadd.f32 1e-05, %v192_v50 }
 0x213   :  { %v191_v52 = vpop.xlane.xlu1 %190 }
 0x214   :  { %2604 = vrsqrt.f32 %v194_v51  ;;  %v193_v53 = vmul.f32 0.03125, %v191_v52 }
 0x216   :  { %v195_v54 = vadd.f32 1e-05, %v193_v53 }
 0x218   :  { %2606 = vrsqrt.f32 %v195_v54 }
 0x221   :  { %v2605_v55 = vpop.eup %2604 }
 0x222   :  { %v198_v57 = vmul.f32 %v2605_v55, %v182_v41 }
 0x224   :  { %v204_v59 = vmul.f32 %v2244_v56, %v198_v57 }
 0x225   :  { %v2607_v60 = vpop.eup %2606 }
 0x226   :  { %v2848_v61 = vadd.f32 %v2245_v58, %v204_v59  ;;  %v199_v62 = vmul.f32 %v2607_v60, %v183_v45 }
 0x228   :  { %v233_v63 = vsel %vm3286_vm1, %v2848_v61, 0.0  ;;  %v205_v0 = vmul.f32 %v2244_v56, %v199_v62 }
 0x229   :  { %234 = vadd.xlane.f32.xlu0 %v233_v63 }
 0x22a   :  { %v2852_v1 = vadd.f32 %v2245_v58, %v205_v0 }
 0x22c   :  { %v236_v2 = vsel %vm175_vm2, %v2852_v1, 0.0 }
 0x22d   :  { %237 = vadd.xlane.f32.xlu1 %v236_v2 }
 0x2b2   :  { %v235_v3 = vpop.xlane.xlu0 %234 }
 0x2b3   :  { %v239_v4 = vmul.f32 0.03125, %v235_v3 }
 0x2b5   :  { %v241_v5 = vsub.f32 %v2848_v61, %v239_v4 }
 0x2b6   :  { %v238_v6 = vpop.xlane.xlu1 %237 }
 0x2b7   :  { %v240_v7 = vmul.f32 0.03125, %v238_v6  ;;  %v243_v8 = vmul.f32 %v241_v5, %v241_v5 }
 0x2b9   :  { %v242_v9 = vsub.f32 %v2852_v1, %v240_v7  ;;  %v245_v10 = vsel %vm3286_vm1, %v243_v8, 0.0  ;;  %v216_v8 = vld [vmem:[%s3280_s4 + $0x20] sm:$0xff] }
 0x2ba   :  { %246 = vadd.xlane.f32.xlu0 %v245_v10 }
 0x2bb   :  { %v244_v11 = vmul.f32 %v242_v9, %v242_v9 }
 0x2bd   :  { %v248_v12 = vsel %vm175_vm2, %v244_v11, 0.0 }
 0x2be   :  { %249 = vadd.xlane.f32.xlu1 %v248_v12 }
 0x343   :  { %v247_v17 = vpop.xlane.xlu0 %246 }
 0x344   :  { %v251_v18 = vmul.f32 0.03125, %v247_v17 }
 0x346   :  { %v253_v19 = vadd.f32 1e-05, %v251_v18 }
 0x347   :  { %v250_v20 = vpop.xlane.xlu1 %249 }
 0x348   :  { %2608 = vrsqrt.f32 %v253_v19  ;;  %v252_v21 = vmul.f32 0.03125, %v250_v20 }
 0x34a   :  { %v254_v23 = vadd.f32 1e-05, %v252_v21 }
 0x34c   :  { %2610 = vrsqrt.f32 %v254_v23 }
 0x355   :  { %v2609_v29 = vpop.eup %2608 }
 0x356   :  { %v257_v30 = vmul.f32 %v2609_v29, %v241_v5 }
 0x358   :  { %v263_v32 = vmul.f32 %v262_v28, %v257_v30 }
 0x359   :  { %v2611_v33 = vpop.eup %2610 }
 0x35a   :  { %v258_v34 = vmul.f32 %v2611_v33, %v242_v9  ;;  %v269_v35 = vadd.f32 %v268_v31, %v263_v32 }
 0x35c   :  { %v264_v36 = vmul.f32 %v262_v28, %v258_v34  ;;  %2429 = vmatprep.mubr.msk.f32.mxu1 %vm3286_vm1, %v269_v35 }
 0x35e   :  { %v270_v37 = vadd.f32 %v268_v31, %v264_v36 }
 0x360   :  { %2430 = vmatmul.mubr.msk.f32.vlgmr.msra.gmra.mxu1 %vm3286_vm1, %v270_v37  ;;  %vm448_vm1 = vcmask 80896  }
 0x420   :  { %v2431_v40 = vpop.f32.mrf.mxu1 }
 0x421   :  { %v2893_v41 = vadd.f32 %v2431_v40, %v274_v39 }
 0x422   :  { %v347_v42 = vpop.f32.mrf.mxu1 }
 0x423   :  { %v2895_v43 = vadd.f32 %v347_v42, %v274_v39  ;;  %360 = vrot.lane.b32.xlu0 %v2893_v41, %s2677_s27 }
 0x425   :  { %358 = vrot.lane.b32.xlu1 %v2895_v43, %s2677_s27  ;;  %2436 = vmatprep.mubr.msk.f32.mxu1 %vm362_vm3, %v2895_v43 }
 0x495   :  { %v361_v44 = vpop.permute.xlu0 %360 }
 0x496   :  { %2432 = vmatprep.subr.msk.mxu1 %vm362_vm3, %v361_v44 }
 0x497   :  { %2433 = vmatpush3.xpose.msk.msra.mxu1 %vm362_vm3, %v361_v44  ;;  %v359_v45 = vpop.permute.xlu1 %358 }
 0x498   :  { %2434 = vmatprep.subr.msk.mxu1 %vm362_vm3, %v359_v45 }
 0x49b   :  { %2435 = vmatpush3.xpose.msk.msra.mxu1 %vm362_vm3, %v359_v45 }
 0x49e   :  { %2437 = vmatmul.mubr.msk.f32.vlgmr.msra.gmra.mxu1 %vm362_vm3, %v2893_v41 }
 0x55e   :  { %v2438_v49 = vpop.f32.mrf.mxu1 }
 0x55f   :  { %v447_v51 = vsel %vm2912_vm14, %v2438_v49, -1e+30  ;;  %v222_v49 = vld [vmem:[%s3280_s4 + $0x50] sm:$0xff] }
 0x560   :  { %v437_v52 = vpop.f32.mrf.mxu1  ;;  %v453_v53 = vsel %vm452_vm15, %v447_v51, -inf }
 0x561   :  { %v446_v54 = vsel %vm2916_vm0, %v437_v52, -1e+30  ;;  %454 = vmax.xlane.f32.xlu0 %v453_v53 }
 0x562   :  { %v449_v55 = vsel %vm448_vm1, %v446_v54, -inf }
 0x563   :  { %450 = vmax.xlane.f32.xlu1 %v449_v55 }
 0x5ea   :  { %v455_v56 = vpop.xlane.xlu0 %454 }
 0x5eb   :  { %v457_v57 = vsub.f32 %v447_v51, %v455_v56 }
 0x5ec   :  { %v451_v58 = vpop.xlane.xlu1 %450 }
 0x5ed   :  { %v460_v59 = vmul.f32 1.442695, %v457_v57  ;;  %v456_v60 = vsub.f32 %v446_v54, %v451_v58  ;;  %v219_v54 = vld [vmem:[%s3280_s4 + $0x38] sm:$0xff]  ;;  %v644_v57 = vsub.s32 5, %v2872_v24 }
 0x5ef   :  { %2612 = vpow2.f32 %v460_v59  ;;  %v458_v62 = vmul.f32 1.442695, %v456_v60  ;;  %v645_v58 = vrot.slane %v2878_v26, %v644_v57 }
 0x5f1   :  { %2614 = vpow2.f32 %v458_v62 }
 0x5fc   :  { %v2613_v63 = vpop.eup %2612 }
 0x5fd   :  { %v465_v0 = vsel %vm452_vm15, %v2613_v63, 0.0 }
 0x5fe   :  { %v2615_v2 = vpop.eup %2614  ;;  %466 = vadd.xlane.f32.xlu1 %v465_v0 }
 0x5ff   :  { %v462_v3 = vsel %vm448_vm1, %v2615_v2, 0.0 }
 0x600   :  { %463 = vadd.xlane.f32.xlu0 %v462_v3 }
 0x60f   :  { %472 = vrot.lane.b32.xlu1 %v2895_v43, %s2678_s28 }
 0x613   :  { %654 = vrot.lane.b32.xlu1 %v2893_v41, %s2679_s29 }
 0x616   :  { %474 = vrot.lane.b32.xlu0 %v2893_v41, %s2678_s28 }
 0x617   :  { %652 = vrot.lane.b32.xlu1 %v2895_v43, %s2679_s29 }
 0x61a   :  { %648 = vrot.lane.b32.xlu0 %v2895_v43, %s2680_s30 }
 0x61b   :  { %650 = vrot.lane.b32.xlu1 %v2893_v41, %s2680_s30 }
 0x687   :  { %v467_v4 = vpop.xlane.xlu1 %466 }
 0x688   :  { %2616 = vrcp.f32 %v467_v4 }
 0x689   :  { %v464_v5 = vpop.xlane.xlu0 %463 }
 0x68a   :  { %2618 = vrcp.f32 %v464_v5 }
 0x68b   :  { %v473_v7 = vpop.permute.xlu1 %472 }
 0x68d   :  { %v475_v6 = vpop.permute.xlu0 %474 }
 0x68e   :  { %2439 = vmatprep.subr.msk.mxu1 %vm483_vm4, %v475_v6 }
 0x68f   :  { %2440 = vmatpush3.msk.msra.mxu1 %vm483_vm4, %v475_v6  ;;  %v655_v14 = vpop.permute.xlu1 %654 }
 0x690   :  { %2441 = vmatprep.subr.mxu1 %v473_v7 }
 0x691   :  { %2442 = vmatpush3.msra.mxu1 %v473_v7  ;;  %v649_v17 = vpop.permute.xlu0 %648 }
 0x692   :  { %2446 = vmatprep.subr.mxu1 %v216_v8 }
 0x693   :  { %v653_v18 = vpop.permute.xlu1 %652 }
 0x695   :  { %v2617_v9 = vpop.eup %2616 }
 0x696   :  { %v471_v12 = vmul.f32 %v2617_v9, %v2613_v63 }
 0x697   :  { %v2619_v10 = vpop.eup %2618  ;;  %v651_v19 = vpop.permute.xlu1 %650 }
 0x698   :  { %v470_v11 = vmul.f32 %v2619_v10, %v2615_v2 }
 0x69a   :  { %2443 = vmatprep.mubr.msk.f32.mxu1 %vm448_vm1, %v470_v11 }
 0x69b   :  { %2444 = vmatmul.mubr.msk.f32.vlgmr.msra.gmra.mxu1 %vm448_vm1, %v471_v12 }
 0x69c   :  { %2447 = vmatpush3.msra.mxu1 %v216_v8 }
 0x69d   :  { %2448 = vmatprep.subr.mxu1 %v213_v13 }
 0x69e   :  { %2449 = vmatpush3.msra.mxu1 %v213_v13 }
 0x69f   :  { %2453 = vmatprep.subr.msk.mxu1 %vm362_vm3, %v655_v14 }
 0x75b   :  { %v2445_v15 = vpop.f32.mrf.mxu1 }
 0x75d   :  { %v552_v16 = vpop.f32.mrf.mxu1 }
 0x75e   :  { %2450 = vmatprep.mubr.msk.f32.mxu1 %vm362_vm3, %v552_v16  ;;  %v220_v16 = vld [vmem:[%s3280_s4 + $0x40] sm:$0xff] }
 0x75f   :  { %2451 = vmatmul.mubr.msk.f32.vlgmr.msra.gmra.mxu1 %vm362_vm3, %v2445_v15  ;;  %v223_v15 = vld [vmem:[%s3280_s4 + $0x58] sm:$0xff] }
 0x760   :  { %2454 = vmatpush3.xpose.msk.msra.mxu1 %vm362_vm3, %v655_v14  ;;  %2457 = vmatprep.mubr.msk.f32.mxu1 %vm362_vm3, %v649_v17  ;;  %v217_v17 = vld [vmem:[%s3280_s4 + $0x28] sm:$0xff] }
 0x761   :  { %2455 = vmatprep.subr.msk.mxu1 %vm362_vm3, %v653_v18 }
 0x764   :  { %2456 = vmatpush3.xpose.msk.msra.mxu1 %vm362_vm3, %v653_v18  ;;  %v214_v18 = vld [vmem:[%s3280_s4 + $0x10] sm:$0xff] }
 0x767   :  { %2458 = vmatmul.mubr.msk.f32.vlgmr.msra.gmra.mxu1 %vm362_vm3, %v651_v19 }
 0x81f   :  { %v2452_v20 = vpop.f32.mrf.mxu1 }
 0x820   :  { %v647_v59 = vadd.f32 %v2452_v20, %v645_v58 }
 0x821   :  { %v633_v21 = vpop.f32.mrf.mxu1 }
 0x822   :  { %v646_v62 = vadd.f32 %v645_v58, %v633_v21 }
 0x827   :  { %v2459_v22 = vpop.f32.mrf.mxu1 }
 0x828   :  { %v740_v23 = vsel %vm2912_vm14, %v2459_v22, -1e+30 }
 0x829   :  { %v730_v28 = vpop.f32.mrf.mxu1  ;;  %v744_v29 = vsel %vm452_vm15, %v740_v23, -inf }
 0x82a   :  { %v739_v30 = vsel %vm2916_vm0, %v730_v28, -1e+30  ;;  %745 = vmax.xlane.f32.xlu1 %v744_v29  ;;  %v964_v29 = vsub.s32 2, %v2872_v24 }
 0x82b   :  { %v741_v31 = vsel %vm448_vm1, %v739_v30, -inf }
 0x82c   :  { %742 = vmax.xlane.f32.xlu0 %v741_v31  ;;  %v965_v31 = vrot.slane %v2878_v26, %v964_v29 }
 0x83b   :  { %763 = vrot.lane.b32.xlu1 %v2895_v43, %s2681_s11 }
 0x8b3   :  { %v746_v32 = vpop.xlane.xlu1 %745 }
 0x8b4   :  { %v748_v33 = vsub.f32 %v740_v23, %v746_v32  ;;  %v970_v32 = vsub.s32 3, %v2872_v24 }
 0x8b5   :  { %v743_v34 = vpop.xlane.xlu0 %742 }
 0x8b6   :  { %v751_v35 = vmul.f32 1.442695, %v748_v33  ;;  %v747_v36 = vsub.f32 %v739_v30, %v743_v34 }
 0x8b7   :  { %v764_v47 = vpop.permute.xlu1 %763 }
 0x8b8   :  { %2620 = vpow2.f32 %v751_v35  ;;  %v749_v37 = vmul.f32 1.442695, %v747_v36 }
 0x8ba   :  { %2622 = vpow2.f32 %v749_v37  ;;  %v971_v37 = vrot.slane %v2878_v26, %v970_v32 }
 0x8c5   :  { %v2621_v39 = vpop.eup %2620 }
 0x8c6   :  { %v756_v40 = vsel %vm452_vm15, %v2621_v39, 0.0 }
 0x8c7   :  { %v2623_v42 = vpop.eup %2622  ;;  %757 = vadd.xlane.f32.xlu0 %v756_v40 }
 0x8c8   :  { %v753_v44 = vsel %vm448_vm1, %v2623_v42, 0.0 }
 0x8cb   :  { %754 = vadd.xlane.f32.xlu0 %v753_v44  ;;  %v231_v44 = vld [vmem:[%s3282_s5 + $0x38] sm:$0xff] }
 0x8cc   :  { %2485 = vmatprep.subr.mxu0 %v231_v44 }
 0x8cd   :  { %2486 = vmatpush3.msra.mxu0 %v231_v44 }
 0x8e1   :  { %765 = vrot.lane.b32.xlu0 %v2893_v41, %s2681_s11 }
 0x950   :  { %v758_v43 = vpop.xlane.xlu0 %757 }
 0x951   :  { %2624 = vrcp.f32 %v758_v43  ;;  %v230_v43 = vld [vmem:[%s3282_s5 + $0x30] sm:$0xff] }
 0x952   :  { %2487 = vmatprep.subr.mxu0 %v230_v43 }
 0x953   :  { %2488 = vmatpush3.msra.mxu0 %v230_v43  ;;  %v3085_v43 = vld [vmem:[%s3281_s6 + $0x8] sm:$0xff] }
 0x954   :  { %v755_v45 = vpop.xlane.xlu0 %754 }
 0x955   :  { %2626 = vrcp.f32 %v755_v45  ;;  %v229_v45 = vld [vmem:[%s3282_s5 + $0x28] sm:$0xff] }
 0x956   :  { %2489 = vmatprep.subr.mxu0 %v229_v45 }
 0x957   :  { %2490 = vmatpush3.msra.mxu0 %v229_v45  ;;  %v1215_v45 = vrot.slane %v3085_v43, %v261_v25  ;;  %v1227_v25 = vrot.slane %v3085_v43, %v273_v38 }
 0x958   :  { %v766_v46 = vpop.permute.xlu0 %765 }
 0x959   :  { %2460 = vmatprep.subr.msk.mxu1 %vm483_vm4, %v766_v46 }
 0x95a   :  { %2461 = vmatpush3.msk.msra.mxu1 %vm483_vm4, %v766_v46  ;;  %v228_v46 = vld [vmem:[%s3282_s5 + $0x20] sm:$0xff] }
 0x95b   :  { %2462 = vmatprep.subr.mxu1 %v764_v47  ;;  %2491 = vmatprep.subr.mxu0 %v228_v46 }
 0x95c   :  { %2463 = vmatpush3.msra.mxu1 %v764_v47  ;;  %2492 = vmatpush3.msra.mxu0 %v228_v46  ;;  %v227_v47 = vld [vmem:[%s3282_s5 + $0x18] sm:$0xff] }
 0x95d   :  { %2467 = vmatprep.subr.mxu1 %v222_v49  ;;  %2493 = vmatprep.subr.mxu0 %v227_v47 }
 0x95e   :  { %v2625_v51 = vpop.eup %2624  ;;  %2494 = vmatpush3.msra.mxu0 %v227_v47  ;;  %v1221_v47 = vrot.slane %v3085_v43, %v267_v27 }
 0x95f   :  { %v762_v53 = vmul.f32 %v2625_v51, %v2621_v39  ;;  %v225_v51 = vld [vmem:[%s3282_s5 + $0x8] sm:$0xff] }
 0x962   :  { %v2627_v52 = vpop.eup %2626 }
 0x963   :  { %v761_v41 = vmul.f32 %v2627_v52, %v2623_v42  ;;  %v224_v52 = vld [vmem:[%s3282_s5] sm:$0xff] }
 0x965   :  { %2464 = vmatprep.mubr.msk.f32.mxu1 %vm448_vm1, %v761_v41  ;;  %v976_v41 = vsub.s32 6, %v2872_v24 }
 0x966   :  { %2465 = vmatmul.mubr.msk.f32.vlgmr.msra.gmra.mxu1 %vm448_vm1, %v762_v53 }
 0x967   :  { %2468 = vmatpush3.msra.mxu1 %v222_v49  ;;  %v226_v49 = vld [vmem:[%s3282_s5 + $0x10] sm:$0xff]  ;;  %v977_v53 = vrot.slane %v2878_v26, %v976_v41 }
 0x968   :  { %2469 = vmatprep.subr.mxu1 %v219_v54  ;;  %2495 = vmatprep.subr.mxu0 %v226_v49 }
 0x969   :  { %2470 = vmatpush3.msra.mxu1 %v219_v54  ;;  %2496 = vmatpush3.msra.mxu0 %v226_v49 }
 0x96a   :  { %2474 = vmatprep.subr.mxu1 %v223_v15  ;;  %2497 = vmatprep.subr.mxu0 %v225_v51 }
 0x96b   :  { %2498 = vmatpush3.msra.mxu0 %v225_v51 }
 0x96c   :  { %2499 = vmatprep.subr.mxu0 %v224_v52 }
 0x96d   :  { %2500 = vmatpush3.msra.mxu0 %v224_v52 }
 0xa26   :  { %v2466_v55 = vpop.f32.mrf.mxu1 }
 0xa28   :  { %v842_v56 = vpop.f32.mrf.mxu1 }
 0xa29   :  { %2471 = vmatprep.mubr.msk.f32.mxu1 %vm362_vm3, %v842_v56 }
 0xa2a   :  { %2472 = vmatmul.mubr.msk.f32.vlgmr.msra.gmra.mxu1 %vm362_vm3, %v2466_v55 }
 0xa2b   :  { %2475 = vmatpush3.msra.mxu1 %v223_v15 }
 0xa2c   :  { %2476 = vmatprep.subr.mxu1 %v220_v16 }
 0xa2d   :  { %2477 = vmatpush3.msra.mxu1 %v220_v16 }
 0xa2e   :  { %2478 = vmatprep.subr.mxu1 %v217_v17 }
 0xa2f   :  { %2479 = vmatpush3.msra.mxu1 %v217_v17 }
 0xa30   :  { %2480 = vmatprep.subr.mxu1 %v214_v18 }
 0xa31   :  { %2481 = vmatpush3.msra.mxu1 %v214_v18 }
 0xaea   :  { %v2473_v60 = vpop.f32.mrf.mxu1 }
 0xaeb   :  { %v933_v63 = vadd.f32 %v2473_v60, %v647_v59 }
 0xaec   :  { %v923_v0 = vpop.f32.mrf.mxu1 }
 0xaed   :  { %v2987_v2 = vadd.f32 %v933_v63, %v2852_v1  ;;  %v932_v3 = vadd.f32 %v923_v0, %v646_v62 }
 0xaef   :  { %v2990_v4 = vadd.f32 %v932_v3, %v2848_v61  ;;  %v939_v5 = vsel %vm175_vm2, %v2987_v2, 0.0 }
 0xaf0   :  { %940 = vadd.xlane.f32.xlu0 %v939_v5 }
 0xaf1   :  { %v936_v6 = vsel %vm3291_vm5, %v2990_v4, 0.0 }
 0xaf2   :  { %937 = vadd.xlane.f32.xlu1 %v936_v6 }
 0xb79   :  { %v941_v7 = vpop.xlane.xlu0 %940 }
 0xb7a   :  { %v943_v8 = vmul.f32 0.03125, %v941_v7 }
 0xb7b   :  { %v938_v9 = vpop.xlane.xlu1 %937 }
 0xb7c   :  { %v945_v10 = vsub.f32 %v2987_v2, %v943_v8  ;;  %v942_v11 = vmul.f32 0.03125, %v938_v9 }
 0xb7e   :  { %v944_v1 = vsub.f32 %v2990_v4, %v942_v11  ;;  %v947_v12 = vmul.f32 %v945_v10, %v945_v10  ;;  %v1077_v11 = vsub.s32 7, %v2872_v24 }
 0xb80   :  { %v951_v61 = vsel %vm175_vm2, %v947_v12, 0.0  ;;  %v946_v13 = vmul.f32 %v944_v1, %v944_v1 }
 0xb81   :  { %952 = vadd.xlane.f32.xlu1 %v951_v61 }
 0xb82   :  { %v948_v14 = vsel %vm3292_vm6, %v946_v13, 0.0 }
 0xb83   :  { %949 = vadd.xlane.f32.xlu0 %v948_v14 }
 0xc0a   :  { %v953_v19 = vpop.xlane.xlu1 %952 }
 0xc0b   :  { %v955_v20 = vmul.f32 0.03125, %v953_v19 }
 0xc0c   :  { %v950_v21 = vpop.xlane.xlu0 %949 }
 0xc0d   :  { %v957_v22 = vadd.f32 1e-05, %v955_v20  ;;  %v954_v23 = vmul.f32 0.03125, %v950_v21 }
 0xc0f   :  { %2628 = vrsqrt.f32 %v957_v22  ;;  %v956_v28 = vadd.f32 1e-05, %v954_v23 }
 0xc11   :  { %2630 = vrsqrt.f32 %v956_v28 }
 0xc1c   :  { %v2629_v30 = vpop.eup %2628 }
 0xc1d   :  { %v961_v33 = vmul.f32 %v2629_v30, %v945_v10 }
 0xc1e   :  { %v2631_v34 = vpop.eup %2630 }
 0xc1f   :  { %v960_v35 = vmul.f32 %v2631_v34, %v944_v1  ;;  %v967_v36 = vmul.f32 %v965_v31, %v961_v33  ;;  %v1078_v1 = vrot.slane %v2878_v26, %v1077_v11  ;;  %v2278_v33 = vld [vmem:[%s3280_s4 + $0x90] sm:$0xff]  ;;  %v2275_v34 = vld [vmem:[%s3280_s4 + $0x78] sm:$0xff] }
 0xc21   :  { %v966_v39 = vmul.f32 %v965_v31, %v960_v35  ;;  %v973_v42 = vadd.f32 %v971_v37, %v967_v36  ;;  %v2281_v31 = vld [vmem:[%s3280_s4 + $0xa8] sm:$0xff]  ;;  %v2272_v35 = vld [vmem:[%s3280_s4 + $0x60] sm:$0xff] }
 0xc22   :  { %2504 = vmatprep.subr.mxu1 %v2281_v31 }
 0xc23   :  { %v972_v40 = vadd.f32 %v971_v37, %v966_v39 }
 0xc25   :  { %2482 = vmatprep.mubr.msk.f32.mxu1 %vm3293_vm7, %v972_v40 }
 0xc26   :  { %2483 = vmatmul.mubr.msk.f32.vlgmr.msra.gmra.mxu1 %vm3294_vm8, %v973_v42 }
 0xc27   :  { %2505 = vmatpush3.msra.mxu1 %v2281_v31 }
 0xc28   :  { %2506 = vmatprep.subr.mxu1 %v2278_v33 }
 0xc29   :  { %2507 = vmatpush3.msra.mxu1 %v2278_v33 }
 0xc2a   :  { %2508 = vmatprep.subr.mxu1 %v2275_v34 }
 0xc2b   :  { %2509 = vmatpush3.msra.mxu1 %v2275_v34  ;;  %v2276_v34 = vld [vmem:[%s3280_s4 + $0x80] sm:$0xff] }
 0xc2c   :  { %2510 = vmatprep.subr.mxu1 %v2272_v35 }
 0xc2d   :  { %2511 = vmatpush3.msra.mxu1 %v2272_v35  ;;  %v2273_v35 = vld [vmem:[%s3280_s4 + $0x68] sm:$0xff] }
 0xce6   :  { %v2484_v54 = vpop.f32.mrf.mxu1 }
 0xce7   :  { %v1056_v55 = vadd.f32 %v2484_v54, %v977_v53 }
 0xce8   :  { %v1050_v56 = vpop.f32.mrf.mxu1 }
 0xce9   :  { %v2269_v58 = vmul.f32 -1.702, %v1056_v55  ;;  %v1051_v59 = vadd.f32 %v1050_v56, %v977_v53 }
 0xceb   :  { %v1065_v60 = vmul.f32 1.442695, %v2269_v58  ;;  %v2268_v62 = vmul.f32 -1.702, %v1051_v59 }
 0xced   :  { %2632 = vpow2.f32 %v1065_v60  ;;  %v1063_v63 = vmul.f32 1.442695, %v2268_v62 }
 0xcef   :  { %2634 = vpow2.f32 %v1063_v63 }
 0xcfa   :  { %v2633_v0 = vpop.eup %2632 }
 0xcfb   :  { %v1068_v3 = vadd.f32 1.0, %v2633_v0 }
 0xcfc   :  { %v2635_v5 = vpop.eup %2634 }
 0xcfd   :  { %v1067_v6 = vadd.f32 1.0, %v2635_v5  ;;  %2636 = vrcp.f32 %v1068_v3 }
 0xcff   :  { %2638 = vrcp.f32 %v1067_v6 }
 0xd0a   :  { %v2637_v7 = vpop.eup %2636 }
 0xd0b   :  { %v1074_v10 = vmul.f32 %v2637_v7, %v1056_v55 }
 0xd0c   :  { %v2639_v8 = vpop.eup %2638 }
 0xd0d   :  { %v1073_v9 = vmul.f32 %v2639_v8, %v1051_v59 }
 0xd0f   :  { %2501 = vmatprep.mubr.msk.f32.mxu0 %vm3295_vm9, %v1073_v9 }
 0xd10   :  { %2502 = vmatmul.mubr.msk.f32.vlgmr.msra.gmra.mxu0 %vm3296_vm10, %v1074_v10 }
 0xdd0   :  { %v2503_v12 = vpop.f32.mrf.mxu0 }
 0xdd1   :  { %v1157_v61 = vadd.f32 %v2503_v12, %v1078_v1 }
 0xdd2   :  { %v1151_v13 = vpop.f32.mrf.mxu0 }
 0xdd3   :  { %v3057_v14 = vadd.f32 %v1157_v61, %v2987_v2  ;;  %v1152_v15 = vadd.f32 %v1151_v13, %v1078_v1 }
 0xdd5   :  { %v3060_v16 = vadd.f32 %v1152_v15, %v2990_v4  ;;  %v1189_v17 = vsel %vm175_vm2, %v3057_v14, 0.0 }
 0xdd6   :  { %1190 = vadd.xlane.f32.xlu1 %v1189_v17 }
 0xdd7   :  { %v1186_v18 = vsel %vm3297_vm11, %v3060_v16, 0.0 }
 0xdd8   :  { %1187 = vadd.xlane.f32.xlu0 %v1186_v18 }
 0xe5f   :  { %v1191_v19 = vpop.xlane.xlu1 %1190 }
 0xe60   :  { %v1193_v26 = vmul.f32 0.03125, %v1191_v19 }
 0xe61   :  { %v1188_v20 = vpop.xlane.xlu0 %1187 }
 0xe62   :  { %v1195_v21 = vsub.f32 %v3057_v14, %v1193_v26  ;;  %v1192_v22 = vmul.f32 0.03125, %v1188_v20 }
 0xe64   :  { %v1194_v2 = vsub.f32 %v3060_v16, %v1192_v22  ;;  %v1197_v23 = vmul.f32 %v1195_v21, %v1195_v21 }
 0xe66   :  { %v1201_v4 = vsel %vm175_vm2, %v1197_v23, 0.0  ;;  %v1196_v28 = vmul.f32 %v1194_v2, %v1194_v2 }
 0xe67   :  { %1202 = vadd.xlane.f32.xlu1 %v1201_v4 }
 0xe68   :  { %v1198_v30 = vsel %vm3298_vm12, %v1196_v28, 0.0 }
 0xe69   :  { %1199 = vadd.xlane.f32.xlu0 %v1198_v30 }
 0xef0   :  { %v1203_v36 = vpop.xlane.xlu1 %1202 }
 0xef1   :  { %v1205_v37 = vmul.f32 0.03125, %v1203_v36 }
 0xef2   :  { %v1200_v39 = vpop.xlane.xlu0 %1199 }
 0xef3   :  { %v1207_v40 = vadd.f32 1e-05, %v1205_v37  ;;  %v1204_v42 = vmul.f32 0.03125, %v1200_v39 }
 0xef5   :  { %2640 = vrsqrt.f32 %v1207_v40  ;;  %v1206_v44 = vadd.f32 1e-05, %v1204_v42 }
 0xef7   :  { %2642 = vrsqrt.f32 %v1206_v44 }
 0xf02   :  { %v2641_v46 = vpop.eup %2640 }
 0xf03   :  { %v1211_v49 = vmul.f32 %v2641_v46, %v1195_v21 }
 0xf04   :  { %v2643_v51 = vpop.eup %2642 }
 0xf05   :  { %v1210_v52 = vmul.f32 %v2643_v51, %v1194_v2  ;;  %v1217_v53 = vmul.f32 %v1215_v45, %v1211_v49 }
 0xf07   :  { %v1216_v54 = vmul.f32 %v1215_v45, %v1210_v52  ;;  %v1223_v55 = vadd.f32 %v1221_v47, %v1217_v53 }
 0xf09   :  { %v1222_v56 = vadd.f32 %v1221_v47, %v1216_v54 }
 0xf0b   :  { %2512 = vmatprep.mubr.msk.f32.mxu1 %vm3299_vm13, %v1222_v56 }
 0xf0c   :  { %2513 = vmatmul.mubr.msk.f32.vlgmr.msra.gmra.mxu1 %vm3291_vm5, %v1223_v55 }
 0xfcc   :  { %v2514_v58 = vpop.f32.mrf.mxu1 }
 0xfcd   :  { %v3098_v59 = vadd.f32 %v2514_v58, %v1227_v25 }
 0xfce   :  { %v1300_v60 = vpop.f32.mrf.mxu1 }
 0xfcf   :  { %v3100_v27 = vadd.f32 %v1300_v60, %v1227_v25  ;;  %1313 = vrot.lane.b32.xlu0 %v3098_v59, %s2677_s27 }
 0xfd1   :  { %1311 = vrot.lane.b32.xlu1 %v3100_v27, %s2677_s27  ;;  %2519 = vmatprep.mubr.msk.f32.mxu1 %vm362_vm3, %v3100_v27 }
0x1041   :  { %v1314_v62 = vpop.permute.xlu0 %1313 }
0x1042   :  { %2515 = vmatprep.subr.msk.mxu1 %vm362_vm3, %v1314_v62 }
0x1043   :  { %2516 = vmatpush3.xpose.msk.msra.mxu1 %vm362_vm3, %v1314_v62  ;;  %v1312_v38 = vpop.permute.xlu1 %1311  ;;  %v2282_v62 = vld [vmem:[%s3280_s4 + $0xb0] sm:$0xff] }
0x1044   :  { %2517 = vmatprep.subr.msk.mxu1 %vm362_vm3, %v1312_v38 }
0x1047   :  { %2518 = vmatpush3.xpose.msk.msra.mxu1 %vm362_vm3, %v1312_v38 }
0x1048   :  { %2529 = vmatprep.subr.mxu1 %v2276_v34 }
0x104a   :  { %2520 = vmatmul.mubr.msk.f32.vlgmr.msra.gmra.mxu1 %vm362_vm3, %v3098_v59 }
0x104b   :  { %2530 = vmatpush3.msra.mxu1 %v2276_v34  ;;  %v2274_v34 = vld [vmem:[%s3280_s4 + $0x70] sm:$0xff] }
0x104c   :  { %2531 = vmatprep.subr.mxu1 %v2273_v35 }
0x104d   :  { %2532 = vmatpush3.msra.mxu1 %v2273_v35 }
0x110a   :  { %v2521_v63 = vpop.f32.mrf.mxu1 }
0x110b   :  { %v1399_v0 = vsel %vm2912_vm14, %v2521_v63, -1e+30 }
0x110c   :  { %v1389_v3 = vpop.f32.mrf.mxu1  ;;  %v1403_v5 = vsel %vm452_vm15, %v1399_v0, -inf }
0x110d   :  { %v1398_v6 = vsel %vm2916_vm0, %v1389_v3, -1e+30  ;;  %1404 = vmax.xlane.f32.xlu0 %v1403_v5  ;;  %v2279_v3 = vld [vmem:[%s3280_s4 + $0x98] sm:$0xff] }
0x110e   :  { %v1400_v7 = vsel %vm448_vm1, %v1398_v6, -inf }
0x110f   :  { %1401 = vmax.xlane.f32.xlu1 %v1400_v7 }
0x1196   :  { %v1405_v8 = vpop.xlane.xlu0 %1404 }
0x1197   :  { %v1407_v9 = vsub.f32 %v1399_v0, %v1405_v8 }
0x1198   :  { %v1402_v10 = vpop.xlane.xlu1 %1401 }
0x1199   :  { %v1410_v1 = vmul.f32 1.442695, %v1407_v9  ;;  %v1406_v12 = vsub.f32 %v1398_v6, %v1402_v10  ;;  %v1594_v9 = vrot.slane %v3085_v43, %v644_v57 }
0x119b   :  { %2644 = vpow2.f32 %v1410_v1  ;;  %v1408_v61 = vmul.f32 1.442695, %v1406_v12 }
0x119d   :  { %2646 = vpow2.f32 %v1408_v61 }
0x11a8   :  { %v2645_v13 = vpop.eup %2644 }
0x11a9   :  { %v1415_v15 = vsel %vm452_vm15, %v2645_v13, 0.0 }
0x11aa   :  { %v2647_v17 = vpop.eup %2646  ;;  %1416 = vadd.xlane.f32.xlu1 %v1415_v15 }
0x11ab   :  { %v1412_v18 = vsel %vm448_vm1, %v2647_v17, 0.0 }
0x11ac   :  { %1413 = vadd.xlane.f32.xlu0 %v1412_v18 }
0x11bb   :  { %1422 = vrot.lane.b32.xlu1 %v3100_v27, %s2678_s28 }
0x11bf   :  { %1603 = vrot.lane.b32.xlu1 %v3098_v59, %s2679_s29 }
0x11c2   :  { %1424 = vrot.lane.b32.xlu0 %v3098_v59, %s2678_s28 }
0x11c3   :  { %1601 = vrot.lane.b32.xlu1 %v3100_v27, %s2679_s29 }
0x11c6   :  { %1597 = vrot.lane.b32.xlu0 %v3100_v27, %s2680_s30 }
0x11c7   :  { %1599 = vrot.lane.b32.xlu1 %v3098_v59, %s2680_s30 }
0x1233   :  { %v1417_v19 = vpop.xlane.xlu1 %1416 }
0x1234   :  { %2648 = vrcp.f32 %v1417_v19 }
0x1235   :  { %v1414_v26 = vpop.xlane.xlu0 %1413 }
0x1236   :  { %2650 = vrcp.f32 %v1414_v26 }
0x1237   :  { %v1423_v20 = vpop.permute.xlu1 %1422 }
0x1239   :  { %v1425_v21 = vpop.permute.xlu0 %1424 }
0x123a   :  { %2522 = vmatprep.subr.msk.mxu0 %vm483_vm4, %v1425_v21 }
0x123b   :  { %2523 = vmatpush3.msk.msra.mxu0 %vm483_vm4, %v1425_v21  ;;  %v1604_v22 = vpop.permute.xlu1 %1603 }
0x123c   :  { %2524 = vmatprep.subr.mxu0 %v1423_v20 }
0x123d   :  { %2525 = vmatpush3.msra.mxu0 %v1423_v20  ;;  %v1598_v30 = vpop.permute.xlu0 %1597 }
0x123e   :  { %2536 = vmatprep.subr.msk.mxu0 %vm362_vm3, %v1604_v22 }
0x123f   :  { %v1602_v31 = vpop.permute.xlu1 %1601 }
0x1241   :  { %v2649_v2 = vpop.eup %2648 }
0x1242   :  { %v1421_v28 = vmul.f32 %v2649_v2, %v2645_v13 }
0x1243   :  { %v2651_v23 = vpop.eup %2650  ;;  %v1600_v33 = vpop.permute.xlu1 %1599 }
0x1244   :  { %v1420_v4 = vmul.f32 %v2651_v23, %v2647_v17 }
0x1246   :  { %2526 = vmatprep.mubr.msk.f32.mxu0 %vm448_vm1, %v1420_v4 }
0x1247   :  { %2527 = vmatmul.mubr.msk.f32.vlgmr.msra.gmra.mxu0 %vm448_vm1, %v1421_v28 }
0x1248   :  { %2537 = vmatpush3.xpose.msk.msra.mxu0 %vm362_vm3, %v1604_v22  ;;  %2540 = vmatprep.mubr.msk.f32.mxu0 %vm362_vm3, %v1598_v30  ;;  %v2283_v30 = vld [vmem:[%s3280_s4 + $0xb8] sm:$0xff] }
0x1249   :  { %2538 = vmatprep.subr.msk.mxu0 %vm362_vm3, %v1602_v31 }
0x124c   :  { %2539 = vmatpush3.xpose.msk.msra.mxu0 %vm362_vm3, %v1602_v31  ;;  %v2280_v31 = vld [vmem:[%s3280_s4 + $0xa0] sm:$0xff] }
0x124d   :  { %2557 = vmatprep.subr.mxu0 %v2283_v30 }
0x124f   :  { %2541 = vmatmul.mubr.msk.f32.vlgmr.msra.gmra.mxu0 %vm362_vm3, %v1600_v33  ;;  %v2277_v33 = vld [vmem:[%s3280_s4 + $0x88] sm:$0xff] }
0x1250   :  { %2558 = vmatpush3.msra.mxu0 %v2283_v30 }
0x1251   :  { %2559 = vmatprep.subr.mxu0 %v2280_v31 }
0x1252   :  { %2560 = vmatpush3.msra.mxu0 %v2280_v31  ;;  %v2153_v31 = vld [vmem:[%s3283_s3 + $0x10] sm:$0xff] }
0x1253   :  { %2561 = vmatprep.subr.mxu0 %v2277_v33 }
0x1254   :  { %2562 = vmatpush3.msra.mxu0 %v2277_v33  ;;  %v2152_v33 = vld [vmem:[%s3283_s3 + $0x8] sm:$0xff] }
0x1255   :  { %2563 = vmatprep.subr.mxu0 %v2274_v34 }
0x1256   :  { %2564 = vmatpush3.msra.mxu0 %v2274_v34  ;;  %v2151_v34 = vld [vmem:[%s3283_s3] sm:$0xff] }
0x1307   :  { %v2528_v36 = vpop.f32.mrf.mxu0 }
0x1309   :  { %v1501_v37 = vpop.f32.mrf.mxu0 }
0x130a   :  { %2533 = vmatprep.mubr.msk.f32.mxu1 %vm362_vm3, %v1501_v37 }
0x130b   :  { %2534 = vmatmul.mubr.msk.f32.vlgmr.msra.gmra.mxu1 %vm362_vm3, %v2528_v36 }
0x130f   :  { %v2542_v39 = vpop.f32.mrf.mxu0 }
0x1310   :  { %v1689_v40 = vsel %vm2912_vm14, %v2542_v39, -1e+30 }
0x1311   :  { %v1679_v42 = vpop.f32.mrf.mxu0  ;;  %v1693_v44 = vsel %vm452_vm15, %v1689_v40, -inf }
0x1312   :  { %v1688_v45 = vsel %vm2916_vm0, %v1679_v42, -1e+30  ;;  %1694 = vmax.xlane.f32.xlu1 %v1693_v44  ;;  %vm3300_vm0 = vmmov %vm3291_vm5 }
0x1313   :  { %v1690_v46 = vsel %vm448_vm1, %v1688_v45, -inf  ;;  %vm3303_vm14 = vmmov %vm3300_vm0 }
0x1314   :  { %1691 = vmax.xlane.f32.xlu0 %v1690_v46  ;;  %vm3306_vm6 = vmmov %vm3300_vm0 }
0x1315   :  { %vm3307_vm7 = vmmov %vm3300_vm0 }
0x1316   :  { %vm3309_vm8 = vmmov %vm3300_vm0 }
0x1323   :  { %1712 = vrot.lane.b32.xlu1 %v3100_v27, %s2681_s11 }
0x139b   :  { %v1695_v47 = vpop.xlane.xlu1 %1694 }
0x139c   :  { %v1697_v49 = vsub.f32 %v1689_v40, %v1695_v47 }
0x139d   :  { %v1692_v51 = vpop.xlane.xlu0 %1691 }
0x139e   :  { %v1700_v52 = vmul.f32 1.442695, %v1697_v49  ;;  %v1696_v53 = vsub.f32 %v1688_v45, %v1692_v51  ;;  %v1914_v45 = vrot.slane %v3085_v43, %v964_v29  ;;  %v2290_v29 = vld [vmem:[%s3282_s5 + $0x70] sm:$0xff] }
0x139f   :  { %v1713_v27 = vpop.permute.xlu1 %1712 }
0x13a0   :  { %2652 = vpow2.f32 %v1700_v52  ;;  %v1698_v48 = vmul.f32 1.442695, %v1696_v53  ;;  %v1920_v52 = vrot.slane %v3085_v43, %v970_v32  ;;  %v2289_v32 = vld [vmem:[%s3282_s5 + $0x68] sm:$0xff] }
0x13a2   :  { %2654 = vpow2.f32 %v1698_v48 }
0x13ad   :  { %v2653_v54 = vpop.eup %2652 }
0x13ae   :  { %v1705_v55 = vsel %vm452_vm15, %v2653_v54, 0.0  ;;  %vm3304_vm15 = vmmov %vm3295_vm9 }
0x13af   :  { %v2655_v50 = vpop.eup %2654  ;;  %1706 = vadd.xlane.f32.xlu0 %v1705_v55  ;;  %v2291_v55 = vld [vmem:[%s3282_s5 + $0x78] sm:$0xff] }
0x13b0   :  { %v1702_v56 = vsel %vm448_vm1, %v2655_v50, 0.0 }
0x13b3   :  { %1703 = vadd.xlane.f32.xlu0 %v1702_v56  ;;  %v2287_v56 = vld [vmem:[%s3282_s5 + $0x58] sm:$0xff] }
0x13c9   :  { %1714 = vrot.lane.b32.xlu0 %v3098_v59, %s2681_s11 }
0x13cb   :  { %v2535_v5 = vpop.f32.mrf.mxu1 }
0x13cc   :  { %v1596_v10 = vadd.f32 %v2535_v5, %v1594_v9 }
0x13cd   :  { %v1582_v6 = vpop.f32.mrf.mxu1 }
0x13ce   :  { %v1595_v12 = vadd.f32 %v1594_v9, %v1582_v6 }
0x1438   :  { %v1707_v25 = vpop.xlane.xlu0 %1706 }
0x1439   :  { %2656 = vrcp.f32 %v1707_v25  ;;  %v2286_v25 = vld [vmem:[%s3282_s5 + $0x50] sm:$0xff] }
0x143c   :  { %v1704_v58 = vpop.xlane.xlu0 %1703 }
0x143d   :  { %2658 = vrcp.f32 %v1704_v58  ;;  %v2285_v58 = vld [vmem:[%s3282_s5 + $0x48] sm:$0xff] }
0x1440   :  { %v1715_v60 = vpop.permute.xlu0 %1714 }
0x1441   :  { %2543 = vmatprep.subr.msk.mxu1 %vm483_vm4, %v1715_v60 }
0x1442   :  { %2544 = vmatpush3.msk.msra.mxu1 %vm483_vm4, %v1715_v60  ;;  %v2284_v60 = vld [vmem:[%s3282_s5 + $0x40] sm:$0xff]  ;;  %vm3305_vm4 = vmmov %vm3295_vm9 }
0x1443   :  { %2545 = vmatprep.subr.mxu1 %v1713_v27 }
0x1444   :  { %2546 = vmatpush3.msra.mxu1 %v1713_v27  ;;  %v1926_v27 = vrot.slane %v3085_v43, %v976_v41 }
0x1445   :  { %2550 = vmatprep.subr.mxu1 %v2282_v62 }
0x1446   :  { %v2657_v38 = vpop.eup %2656 }
0x1447   :  { %v1711_v0 = vmul.f32 %v2657_v38, %v2653_v54 }
0x144a   :  { %v2659_v63 = vpop.eup %2658 }
0x144b   :  { %v1710_v59 = vmul.f32 %v2659_v63, %v2655_v50  ;;  %v2288_v50 = vld [vmem:[%s3282_s5 + $0x60] sm:$0xff] }
0x144d   :  { %2547 = vmatprep.mubr.msk.f32.mxu1 %vm448_vm1, %v1710_v59 }
0x144e   :  { %2548 = vmatmul.mubr.msk.f32.vlgmr.msra.gmra.mxu1 %vm448_vm1, %v1711_v0  ;;  %vm3301_vm1 = vmmov %vm3300_vm0 }
0x144f   :  { %2551 = vmatpush3.msra.mxu1 %v2282_v62 }
0x1450   :  { %2552 = vmatprep.subr.mxu1 %v2279_v3 }
0x1451   :  { %2553 = vmatpush3.msra.mxu1 %v2279_v3 }
0x1452   :  { %2568 = vmatprep.subr.mxu1 %v2291_v55 }
0x150e   :  { %v2549_v7 = vpop.f32.mrf.mxu1 }
0x1510   :  { %v1791_v8 = vpop.f32.mrf.mxu1 }
0x1511   :  { %2554 = vmatprep.mubr.msk.f32.mxu1 %vm362_vm3, %v1791_v8 }
0x1512   :  { %2555 = vmatmul.mubr.msk.f32.vlgmr.msra.gmra.mxu1 %vm362_vm3, %v2549_v7  ;;  %vm3302_vm3 = vmmov %vm3300_vm0 }
0x1513   :  { %2569 = vmatpush3.msra.mxu1 %v2291_v55 }
0x1514   :  { %2570 = vmatprep.subr.mxu1 %v2290_v29 }
0x1515   :  { %2571 = vmatpush3.msra.mxu1 %v2290_v29 }
0x1516   :  { %2572 = vmatprep.subr.mxu1 %v2289_v32 }
0x1517   :  { %2573 = vmatpush3.msra.mxu1 %v2289_v32 }
0x1518   :  { %2574 = vmatprep.subr.mxu1 %v2288_v50 }
0x1519   :  { %2575 = vmatpush3.msra.mxu1 %v2288_v50 }
0x151a   :  { %2576 = vmatprep.subr.mxu1 %v2287_v56 }
0x151b   :  { %2577 = vmatpush3.msra.mxu1 %v2287_v56 }
0x151c   :  { %2578 = vmatprep.subr.mxu1 %v2286_v25 }
0x151d   :  { %2579 = vmatpush3.msra.mxu1 %v2286_v25 }
0x151e   :  { %2580 = vmatprep.subr.mxu1 %v2285_v58 }
0x151f   :  { %2581 = vmatpush3.msra.mxu1 %v2285_v58 }
0x1520   :  { %2582 = vmatprep.subr.mxu1 %v2284_v60 }
0x1521   :  { %2583 = vmatpush3.msra.mxu1 %v2284_v60 }
0x15d2   :  { %v2556_v1 = vpop.f32.mrf.mxu1 }
0x15d3   :  { %v1882_v61 = vadd.f32 %v2556_v1, %v1596_v10 }
0x15d4   :  { %v1872_v13 = vpop.f32.mrf.mxu1 }
0x15d5   :  { %v3180_v15 = vadd.f32 %v1882_v61, %v3057_v14  ;;  %v1881_v17 = vadd.f32 %v1872_v13, %v1595_v12  ;;  %v2027_v13 = vrot.slane %v3085_v43, %v1077_v11 }
0x15d7   :  { %v3183_v18 = vadd.f32 %v1881_v17, %v3060_v16  ;;  %v1888_v19 = vsel %vm175_vm2, %v3180_v15, 0.0 }
0x15d8   :  { %1889 = vadd.xlane.f32.xlu0 %v1888_v19 }
0x15d9   :  { %v1885_v26 = vsel %vm3300_vm0, %v3183_v18, 0.0 }
0x15da   :  { %1886 = vadd.xlane.f32.xlu1 %v1885_v26 }
0x1661   :  { %v1890_v57 = vpop.xlane.xlu0 %1889 }
0x1662   :  { %v1892_v20 = vmul.f32 0.03125, %v1890_v57 }
0x1663   :  { %v1887_v21 = vpop.xlane.xlu1 %1886 }
0x1664   :  { %v1894_v22 = vsub.f32 %v3180_v15, %v1892_v20  ;;  %v1891_v2 = vmul.f32 0.03125, %v1887_v21 }
0x1666   :  { %v1893_v14 = vsub.f32 %v3183_v18, %v1891_v2  ;;  %v1896_v23 = vmul.f32 %v1894_v22, %v1894_v22 }
0x1668   :  { %v1900_v16 = vsel %vm175_vm2, %v1896_v23, 0.0  ;;  %v1895_v4 = vmul.f32 %v1893_v14, %v1893_v14 }
0x1669   :  { %1901 = vadd.xlane.f32.xlu1 %v1900_v16 }
0x166a   :  { %v1897_v28 = vsel %vm3301_vm1, %v1895_v4, 0.0 }
0x166b   :  { %1898 = vadd.xlane.f32.xlu0 %v1897_v28 }
0x16f2   :  { %v1902_v35 = vpop.xlane.xlu1 %1901 }
0x16f3   :  { %v1904_v36 = vmul.f32 0.03125, %v1902_v35 }
0x16f4   :  { %v1899_v37 = vpop.xlane.xlu0 %1898 }
0x16f5   :  { %v1906_v39 = vadd.f32 1e-05, %v1904_v36  ;;  %v1903_v40 = vmul.f32 0.03125, %v1899_v37 }
0x16f7   :  { %2660 = vrsqrt.f32 %v1906_v39  ;;  %v1905_v42 = vadd.f32 1e-05, %v1903_v40 }
0x16f9   :  { %2662 = vrsqrt.f32 %v1905_v42 }
0x1704   :  { %v2661_v44 = vpop.eup %2660 }
0x1705   :  { %v1910_v46 = vmul.f32 %v2661_v44, %v1894_v22 }
0x1706   :  { %v2663_v47 = vpop.eup %2662 }
0x1707   :  { %v1909_v49 = vmul.f32 %v2663_v47, %v1893_v14  ;;  %v1916_v51 = vmul.f32 %v1914_v45, %v1910_v46 }
0x1709   :  { %v1915_v53 = vmul.f32 %v1914_v45, %v1909_v49  ;;  %v1922_v54 = vadd.f32 %v1920_v52, %v1916_v51  ;;  %v2319_v45 = vld [vmem:[%s3279_s2 + $0xc] ss:$0 sm:$0xff] }
0x170b   :  { %v1921_v48 = vadd.f32 %v1920_v52, %v1915_v53  ;;  %v2320_v52 = vld [vmem:[%s3279_s2 + $0xd] ss:$0 sm:$0xff] }
0x170d   :  { %2565 = vmatprep.mubr.msk.f32.mxu0 %vm3302_vm3, %v1921_v48 }
0x170e   :  { %2566 = vmatmul.mubr.msk.f32.vlgmr.msra.gmra.mxu0 %vm3303_vm14, %v1922_v54 }
0x17ce   :  { %v2567_v62 = vpop.f32.mrf.mxu0 }
0x17cf   :  { %v2005_v38 = vadd.f32 %v2567_v62, %v1926_v27 }
0x17d0   :  { %v1999_v63 = vpop.f32.mrf.mxu0 }
0x17d1   :  { %v2316_v59 = vmul.f32 -1.702, %v2005_v38  ;;  %v2000_v0 = vadd.f32 %v1999_v63, %v1926_v27 }
0x17d3   :  { %v2014_v3 = vmul.f32 1.442695, %v2316_v59  ;;  %v2315_v5 = vmul.f32 -1.702, %v2000_v0 }
0x17d5   :  { %2664 = vpow2.f32 %v2014_v3  ;;  %v2012_v6 = vmul.f32 1.442695, %v2315_v5 }
0x17d7   :  { %2666 = vpow2.f32 %v2012_v6 }
0x17e2   :  { %v2665_v7 = vpop.eup %2664 }
0x17e3   :  { %v2017_v8 = vadd.f32 1.0, %v2665_v7 }
0x17e4   :  { %v2667_v9 = vpop.eup %2666 }
0x17e5   :  { %v2016_v10 = vadd.f32 1.0, %v2667_v9  ;;  %2668 = vrcp.f32 %v2017_v8 }
0x17e7   :  { %2670 = vrcp.f32 %v2016_v10 }
0x17f2   :  { %v2669_v1 = vpop.eup %2668 }
0x17f3   :  { %v2023_v41 = vmul.f32 %v2669_v1, %v2005_v38 }
0x17f4   :  { %v2671_v12 = vpop.eup %2670 }
0x17f5   :  { %v2022_v61 = vmul.f32 %v2671_v12, %v2000_v0 }
0x17f7   :  { %2584 = vmatprep.mubr.msk.f32.mxu1 %vm3304_vm15, %v2022_v61 }
0x17f8   :  { %2585 = vmatmul.mubr.msk.f32.vlgmr.msra.gmra.mxu1 %vm3305_vm4, %v2023_v41 }
0x18b8   :  { %v2586_v17 = vpop.f32.mrf.mxu1 }
0x18b9   :  { %v2106_v19 = vadd.f32 %v2586_v17, %v2027_v13 }
0x18ba   :  { %v2100_v26 = vpop.f32.mrf.mxu1 }
0x18bb   :  { %v2101_v57 = vadd.f32 %v2100_v26, %v2027_v13  ;;  %v2110_v20 = vadd.f32 %v2106_v19, %v3180_v15 }
0x18bd   :  { %v2116_v21 = vsel %vm175_vm2, %v2110_v20, 0.0  ;;  %v2109_v22 = vadd.f32 %v2101_v57, %v3183_v18  ;;  %v2154_v18 = vld [vmem:[%s3283_s3 + $0x18] sm:$0xff] }
0x18be   :  { %2117 = vadd.xlane.f32.xlu1 %v2116_v21  ;;  %2587 = vmatprep.subr.mxu0 %v2154_v18 }
0x18bf   :  { %v2113_v2 = vsel %vm3306_vm6, %v2109_v22, 0.0  ;;  %2588 = vmatpush3.msra.mxu0 %v2154_v18 }
0x18c0   :  { %2114 = vadd.xlane.f32.xlu0 %v2113_v2  ;;  %2589 = vmatprep.subr.mxu0 %v2153_v31 }
0x18c1   :  { %2590 = vmatpush3.msra.mxu0 %v2153_v31 }
0x18c2   :  { %2591 = vmatprep.subr.mxu0 %v2152_v33 }
0x18c3   :  { %2592 = vmatpush3.msra.mxu0 %v2152_v33 }
0x18c4   :  { %2593 = vmatprep.subr.mxu0 %v2151_v34 }
0x18c5   :  { %2594 = vmatpush3.msra.mxu0 %v2151_v34 }
0x1947   :  { %v2118_v14 = vpop.xlane.xlu1 %2117 }
0x1948   :  { %v2120_v23 = vmul.f32 0.03125, %v2118_v14 }
0x1949   :  { %v2115_v16 = vpop.xlane.xlu0 %2114 }
0x194a   :  { %v2122_v24 = vsub.f32 %v2110_v20, %v2120_v23  ;;  %v2119_v4 = vmul.f32 0.03125, %v2115_v16 }
0x194c   :  { %v2121_v11 = vsub.f32 %v2109_v22, %v2119_v4  ;;  %v2124_v43 = vmul.f32 %v2122_v24, %v2122_v24 }
0x194e   :  { %v2128_v28 = vsel %vm175_vm2, %v2124_v43, 0.0  ;;  %v2123_v30 = vmul.f32 %v2121_v11, %v2121_v11  ;;  %vm3308_vm2 = vmmov %vm3300_vm0 }
0x194f   :  { %2129 = vadd.xlane.f32.xlu1 %v2128_v28 }
0x1950   :  { %v2125_v15 = vsel %vm3307_vm7, %v2123_v30, 0.0 }
0x1951   :  { %2126 = vadd.xlane.f32.xlu0 %v2125_v15 }
0x19d8   :  { %v2130_v35 = vpop.xlane.xlu1 %2129 }
0x19d9   :  { %v2132_v36 = vmul.f32 0.03125, %v2130_v35 }
0x19da   :  { %v2127_v37 = vpop.xlane.xlu0 %2126 }
0x19db   :  { %v2134_v39 = vadd.f32 1e-05, %v2132_v36  ;;  %v2131_v40 = vmul.f32 0.03125, %v2127_v37 }
0x19dd   :  { %2672 = vrsqrt.f32 %v2134_v39  ;;  %v2133_v42 = vadd.f32 1e-05, %v2131_v40 }
0x19df   :  { %2674 = vrsqrt.f32 %v2133_v42 }
0x19ea   :  { %v2673_v44 = vpop.eup %2672 }
0x19eb   :  { %v2138_v46 = vmul.f32 %v2673_v44, %v2122_v24 }
0x19ec   :  { %v2675_v47 = vpop.eup %2674 }
0x19ed   :  { %v2137_v49 = vmul.f32 %v2675_v47, %v2121_v11  ;;  %v2144_v51 = vmul.f32 %v2319_v45, %v2138_v46 }
0x19ef   :  { %v2143_v53 = vmul.f32 %v2319_v45, %v2137_v49  ;;  %v2150_v54 = vadd.f32 %v2320_v52, %v2144_v51 }
0x19f1   :  { %v2149_v48 = vadd.f32 %v2320_v52, %v2143_v53 }
0x19f3   :  { %2595 = vmatprep.mubr.msk.f32.mxu0 %vm3308_vm2, %v2149_v48 }
0x19f4   :  { %2596 = vmatmul.mubr.msk.f32.vlgmr.msra.gmra.mxu0 %vm3309_vm8, %v2150_v54 }
0x1ab4   :  { %v2597_v55 = vpop.f32.mrf.mxu0 }
0x1ab5   :  { %2237 = vst [vmem:[%s3284_s7 + $0x8] sm:$0x3] %v2597_v55 }
0x1ab6   :  { %v2227_v29 = vpop.f32.mrf.mxu0 }
0x1ab7   :  { %2236 = vst [vmem:[%s3284_s7] sm:$0xff] %v2227_v29 }

</bundles_post_ra>
